<compile_context>
chip_gen: v7x
topology: tpu7x:2x2x1
jax: 0.10.0
libtpu: 0.0.40
codegen_flags: <defaults>
</compile_context>

<pallas_src>
import functools

import jax
import jax.numpy as jnp
from jax.experimental import pallas as pl
from jax.experimental.pallas import tpu as pltpu

_EPS = float(jnp.finfo(jnp.float32).eps)        # matches F.rms_norm default eps
_HIGHEST = jax.lax.Precision.HIGHEST
_VMEM_LIMIT = 48 * 1024 * 1024                   # under v7x's 64 MiB physical VMEM


# ----------------------------------------------------------------------------
# tile pickers
# ----------------------------------------------------------------------------
def _pick_tile(n, pref):
    """Largest power-of-two tile <= pref dividing n (falls back to n itself)."""
    if n <= pref:
        return n
    t = pref
    while t > 1 and n % t:
        t //= 2
    return t if n % t == 0 else n


def _pick_row_tile(rows, d, max_bytes=1 << 20):
    """Row tile for the elementwise pass, keeping each (tile, d) f32 block small."""
    if rows * d * 4 <= max_bytes:
        return rows
    for cand in (2048, 1024, 512, 256, 128, 64, 32, 16, 8):
        if rows % cand == 0 and cand * d * 4 <= max_bytes:
            return cand
    return rows


# ----------------------------------------------------------------------------
# 1) tiled matmul kernel (used for fused qkv projection and c_proj)
# ----------------------------------------------------------------------------
def _matmul_kernel(a_ref, b_ref, o_ref, acc_ref):
    @pl.when(pl.program_id(2) == 0)
    def _():
        acc_ref[...] = jnp.zeros_like(acc_ref)

    acc_ref[...] += jnp.dot(a_ref[...], b_ref[...],
                            preferred_element_type=jnp.float32,
                            precision=_HIGHEST)

    @pl.when(pl.program_id(2) == pl.num_programs(2) - 1)
    def _():
        o_ref[...] = acc_ref[...].astype(o_ref.dtype)


def matmul(a, b, *, tm=256, tn=256, tk=512):
    M, K = a.shape
    K2, N = b.shape
    assert K == K2
    tm, tn, tk = _pick_tile(M, tm), _pick_tile(N, tn), _pick_tile(K, tk)
    return pl.pallas_call(
        _matmul_kernel,
        out_shape=jax.ShapeDtypeStruct((M, N), a.dtype),
        grid_spec=pltpu.PrefetchScalarGridSpec(
            num_scalar_prefetch=0,
            grid=(M // tm, N // tn, K // tk),
            in_specs=[pl.BlockSpec((tm, tk), lambda i, j, k: (i, k)),
                      pl.BlockSpec((tk, tn), lambda i, j, k: (k, j))],
            out_specs=pl.BlockSpec((tm, tn), lambda i, j, k: (i, j)),
            scratch_shapes=[pltpu.VMEM((tm, tn), jnp.float32)],
        ),
        compiler_params=pltpu.CompilerParams(
            dimension_semantics=("parallel", "parallel", "arbitrary"),
            vmem_limit_bytes=_VMEM_LIMIT,
        ),
    )(a, b)


# ----------------------------------------------------------------------------
# 2) fused rms_norm + rotary (rotate-half) + lambda v-mix kernel
# ----------------------------------------------------------------------------
def _prep_kernel(lam_ref, cos_ref, sin_ref, q_ref, k_ref, v_ref, ve_ref,
                 qo_ref, ko_ref, vo_ref, *, half, q_scale):
    cos = cos_ref[...]            # (rows, D)   full-width table
    sin = sin_ref[...]            # (rows, D)   second half already negated

    def norm_rotate(x_in, x_out, post_scale):
        x = x_in[...].astype(jnp.float32)
        ms = jnp.mean(x * x, axis=-1, keepdims=True)
        # rms_norm (no weight); post_scale folds the attention 1/sqrt(D) into q.
        xn = x * (jax.lax.rsqrt(ms + _EPS) * post_scale)
        rot = pltpu.roll(xn, shift=half, axis=1)          # [x2, x1] rotate-half
        x_out[...] = (xn * cos + rot * sin).astype(x_out.dtype)

    norm_rotate(q_ref, qo_ref, q_scale)
    norm_rotate(k_ref, ko_ref, 1.0)

    lam0 = lam_ref[0]
    lam1 = lam_ref[1]
    vo_ref[...] = (lam0 * v_ref[...].astype(jnp.float32)
                   + lam1 * ve_ref[...].astype(jnp.float32)).astype(vo_ref.dtype)


def qkv_prep(lambdas, cos_rows, sin_rows, q, k, v, ve, *, q_scale):
    """q/k/v/ve: (B, T*H, D); cos/sin rows: (T*H, D)."""
    B, R, D = q.shape
    tile = _pick_row_tile(R, D)
    kernel = functools.partial(_prep_kernel, half=D // 2, q_scale=q_scale)

    x_spec = pl.BlockSpec((None, tile, D), lambda b, t: (b, t, 0))
    t_spec = pl.BlockSpec((tile, D), lambda b, t: (t, 0))
    out_sds = jax.ShapeDtypeStruct((B, R, D), q.dtype)

    return pl.pallas_call(
        kernel,
        out_shape=(out_sds, out_sds, out_sds),
        grid_spec=pltpu.PrefetchScalarGridSpec(
            num_scalar_prefetch=0,
            grid=(B, R // tile),
            in_specs=[
                pl.BlockSpec(memory_space=pltpu.MemorySpace.SMEM),   # lambdas
                t_spec, t_spec,                                      # cos, sin
                x_spec, x_spec, x_spec, x_spec,                      # q, k, v, ve
            ],
            out_specs=[x_spec, x_spec, x_spec],
        ),
        compiler_params=pltpu.CompilerParams(
            dimension_semantics=("parallel", "parallel"),
            vmem_limit_bytes=_VMEM_LIMIT,
        ),
    )(lambdas, cos_rows, sin_rows, q, k, v, ve)


# ----------------------------------------------------------------------------
# 3) causal flash attention kernel (scale already folded into q)
# ----------------------------------------------------------------------------
def _flash_kernel(q_ref, k_ref, v_ref, o_ref, m_sc, l_sc, acc_sc, *, tq, tk):
    qi = pl.program_id(2)
    ki = pl.program_id(3)

    @pl.when(ki == 0)
    def _():
        m_sc[...] = jnp.full(m_sc.shape, -1e30, jnp.float32)
        l_sc[...] = jnp.zeros(l_sc.shape, jnp.float32)
        acc_sc[...] = jnp.zeros(acc_sc.shape, jnp.float32)

    # Skip key blocks strictly above the causal diagonal (their DMA is already
    # avoided by the clamped kv index_map below).
    @pl.when(ki * tk <= qi * tq + (tq - 1))
    def _():
        q = q_ref[...].astype(jnp.float32)                 # (tq, D)
        k = k_ref[...].astype(jnp.float32)                 # (tk, D)
        s = jax.lax.dot_general(q, k, (((1,), (1,)), ((), ())),
                                preferred_element_type=jnp.float32,
                                precision=_HIGHEST)
        row = qi * tq + jax.lax.broadcasted_iota(jnp.int32, (tq, tk), 0)
        col = ki * tk + jax.lax.broadcasted_iota(jnp.int32, (tq, tk), 1)
        s = jnp.where(col <= row, s, -1e30)

        m_prev = m_sc[...]
        m_new = jnp.maximum(m_prev, jnp.max(s, axis=-1, keepdims=True))
        alpha = jnp.exp(m_prev - m_new)
        p = jnp.exp(s - m_new)
        l_sc[...] = alpha * l_sc[...] + jnp.sum(p, axis=-1, keepdims=True)
        acc_sc[...] = alpha * acc_sc[...] + jnp.dot(
            p, v_ref[...].astype(jnp.float32),
            preferred_element_type=jnp.float32, precision=_HIGHEST)
        m_sc[...] = m_new

    @pl.when(ki == pl.num_programs(3) - 1)
    def _():
        o_ref[...] = (acc_sc[...] / l_sc[...]).astype(o_ref.dtype)


def flash_attention_causal(q, k, v):
    """q, k, v: (B, H, T, D) -> causal attention output (B, H, T, D).
    q is expected to be pre-scaled by 1/sqrt(D)."""
    B, H, T, D = q.shape
    tq = _pick_tile(T, 256)
    tk = _pick_tile(T, 256)
    kernel = functools.partial(_flash_kernel, tq=tq, tk=tk)

    q_spec = pl.BlockSpec((None, None, tq, D), lambda b, h, qi, ki: (b, h, qi, 0))

    def kv_index(b, h, qi, ki):
        # Clamp the key-block index to the causal diagonal: iterations that are
        # fully masked re-use the previously fetched block index, so Pallas
        # issues no HBM DMA for them.
        last_needed = (qi * tq + (tq - 1)) // tk
        return (b, h, jnp.minimum(ki, last_needed), 0)

    kv_spec = pl.BlockSpec((None, None, tk, D), kv_index)

    return pl.pallas_call(
        kernel,
        out_shape=jax.ShapeDtypeStruct((B, H, T, D), q.dtype),
        grid_spec=pltpu.PrefetchScalarGridSpec(
            num_scalar_prefetch=0,
            grid=(B, H, T // tq, T // tk),
            in_specs=[q_spec, kv_spec, kv_spec],
            out_specs=q_spec,
            scratch_shapes=[pltpu.VMEM((tq, 1), jnp.float32),
                            pltpu.VMEM((tq, 1), jnp.float32),
                            pltpu.VMEM((tq, D), jnp.float32)],
        ),
        compiler_params=pltpu.CompilerParams(
            dimension_semantics=("parallel", "parallel", "parallel", "arbitrary"),
            vmem_limit_bytes=_VMEM_LIMIT,
        ),
    )(q, k, v)


# ----------------------------------------------------------------------------
# rotary tables + full forward
# ----------------------------------------------------------------------------
def make_rotary_tables(head_dim, max_seq_len):
    assert head_dim % 4 == 0, "Rotary requires head_dim % 4 == 0"
    angular_freq = (1.0 / 1024.0) ** jnp.linspace(0.0, 1.0, num=head_dim // 4,
                                                  dtype=jnp.float32)
    angular_freq = jnp.concatenate([angular_freq,
                                    jnp.zeros((head_dim // 4,), jnp.float32)])
    t = jnp.arange(max_seq_len, dtype=jnp.float32)
    theta = jnp.einsum("i,j->ij", t, angular_freq)        # (max_seq_len, D//2)
    return jnp.cos(theta), jnp.sin(theta)


def causal_self_attention_forward(x, params, ve, cos_tab, sin_tab, num_heads):
    B, T, dim = x.shape
    H = num_heads
    D = dim // H

    # --- fused q/k/v projection (CastedLinear: y = x @ W.T) ---
    # NOTE: in a real training step the concatenated weight would be built once
    # outside the step function; it is tiny relative to the matmul itself.
    w_qkv = jnp.concatenate([params["wq"], params["wk"], params["wv"]], axis=0)
    x2d = x.reshape(B * T, dim)
    qkv = matmul(x2d, w_qkv.T)                            # (B*T, 3*dim)

    # (B, T*H, D): sublane-dense rows even when H < 8 (reshapes are free).
    q3 = qkv[:, :dim].reshape(B, T * H, D)
    k3 = qkv[:, dim:2 * dim].reshape(B, T * H, D)
    v3 = qkv[:, 2 * dim:].reshape(B, T * H, D)

    # ve is None  =>  v = lambdas[0] * v  (feed zeros for ve)
    ve3 = (jnp.zeros((B, T * H, D), x.dtype) if ve is None
           else ve.reshape(B, T * H, D).astype(x.dtype))

    # Full-width rotate-half tables, repeated over heads so the fused pass is a
    # pure lane-dense 2-D elementwise kernel.
    # TODO(synk): for H >= 8, keep the (B, T, H, D) block layout and broadcast
    # the (T, D) tables in-kernel to avoid re-reading the H-times-repeated table.
    cos = cos_tab[:T]
    sin = sin_tab[:T]
    cos_rows = jnp.repeat(jnp.concatenate([cos, cos], axis=-1), H, axis=0)
    sin_rows = jnp.repeat(jnp.concatenate([sin, -sin], axis=-1), H, axis=0)

    qr, kr, vm = qkv_prep(params["lambdas"], cos_rows, sin_rows, q3, k3, v3, ve3,
                          q_scale=1.0 / (D ** 0.5))

    def to_bhtd(a):
        return a.reshape(B, T, H, D).transpose(0, 2, 1, 3)

    y = flash_attention_causal(to_bhtd(qr), to_bhtd(kr), to_bhtd(vm))
    y = y.transpose(0, 2, 1, 3).reshape(B * T, dim)

    # --- output projection ---
    return matmul(y, params["wproj"].T).reshape(B, T, dim)


# ----------------------------------------------------------------------------
# pure-JAX reference + test
# ----------------------------------------------------------------------------
def _reference_forward(x, params, ve, cos_tab, sin_tab, num_heads):
    B, T, dim = x.shape
    H = num_heads
    D = dim // H
    dot = functools.partial(jnp.dot, precision=_HIGHEST)

    q = dot(x, params["wq"].T).reshape(B, T, H, D)
    k = dot(x, params["wk"].T).reshape(B, T, H, D)
    v = dot(x, params["wv"].T).reshape(B, T, H, D)
    lam = params["lambdas"]
    v = lam[0] * v if ve is None else lam[0] * v + lam[1] * ve.reshape(B, T, H, D)

    def rms_norm(a):
        af = a.astype(jnp.float32)
        ms = jnp.mean(af * af, axis=-1, keepdims=True)
        return (af * jax.lax.rsqrt(ms + _EPS)).astype(a.dtype)

    def rotary(a):
        cos = cos_tab[None, :T, None, :]
        sin = sin_tab[None, :T, None, :]
        af = a.astype(jnp.float32)
        a1, a2 = af[..., :D // 2], af[..., D // 2:]
        y1 = a1 * cos + a2 * sin
        y2 = -a1 * sin + a2 * cos
        return jnp.concatenate([y1, y2], axis=-1).astype(a.dtype)

    q, k = rotary(rms_norm(q)), rotary(rms_norm(k))
    q, k, v = (a.transpose(0, 2, 1, 3) for a in (q, k, v))

    s = jnp.einsum("bhqd,bhkd->bhqk", q.astype(jnp.float32), k.astype(jnp.float32),
                   precision=_HIGHEST) / (D ** 0.5)
    mask = jnp.tril(jnp.ones((T, T), dtype=bool))
    s = jnp.where(mask[None, None], s, -jnp.inf)
    p = jax.nn.softmax(s, axis=-1)
    y = jnp.einsum("bhqk,bhkd->bhqd", p, v.astype(jnp.float32),
                   precision=_HIGHEST).astype(x.dtype)
    y = y.transpose(0, 2, 1, 3).reshape(B, T, dim)
    return dot(y, params["wproj"].T)


def _casted_linear_init(key, in_features, out_features):
    std = 0.5 * in_features ** -0.5
    bound = (3 ** 0.5) * std
    return jax.random.uniform(key, (out_features, in_features), jnp.float32,
                              minval=-bound, maxval=bound)


if __name__ == "__main__":
    # Small shapes consistent with the module: B must be 1 (flex_attention
    # assert); head_dim = 128 keeps every block lane-aligned on TPU.
    B, T, num_heads, dim = 1, 16, 2, 256
    head_dim = dim // num_heads
    max_seq_len = 64

    key = jax.random.PRNGKey(0)
    kx, kve, kq, kk, kv, kp = jax.random.split(key, 6)
    x = jax.random.normal(kx, (B, T, dim), jnp.float32)
    ve = jax.random.normal(kve, (B, T, num_heads, head_dim), jnp.float32)

    params = {
        "wq": _casted_linear_init(kq, dim, dim),
        "wk": _casted_linear_init(kk, dim, dim),
        "wv": _casted_linear_init(kv, dim, dim),
        # NOTE: original zero-inits c_proj; a random init keeps the numerical
        # check non-trivial while forward semantics are identical.
        "wproj": _casted_linear_init(kp, dim, dim),
        "lambdas": jnp.array([0.5, 0.5], jnp.float32),
    }
    cos_tab, sin_tab = make_rotary_tables(head_dim, max_seq_len)

    out = causal_self_attention_forward(x, params, ve, cos_tab, sin_tab, num_heads)
    out = jax.block_until_ready(out)

    ref = _reference_forward(x, params, ve, cos_tab, sin_tab, num_heads)
    assert out.shape == (B, T, dim) and out.dtype == x.dtype
    assert jnp.allclose(out, ref, atol=1e-4, rtol=1e-4), float(
        jnp.max(jnp.abs(out - ref)))

    print("KERNEL_OK")
</pallas_src>

<mosaic_0001>
module attributes {stable_mosaic.version = 11 : i64} {
  func.func @_matmul_kernel(%arg0: i32, %arg1: i32, %arg2: i32, %arg3: memref<16x256xf32, #tpu.memory_space<vmem>>, %arg4: memref<256x256xf32, #tpu.memory_space<vmem>>, %arg5: memref<16x256xf32, #tpu.memory_space<vmem>>, %arg6: memref<16x256xf32, #tpu.memory_space<vmem>>) attributes {dimension_semantics = [#tpu.dimension_semantics<parallel>, #tpu.dimension_semantics<parallel>, #tpu.dimension_semantics<arbitrary>], iteration_bounds = array<i64: 1, 3, 1>, scalar_prefetch = 0 : i64, scratch_operands = 1 : i64, tpu.core_type = #tpu.core_type<tc>, window_params = [{transform_indices = @transform_0, window_bounds = array<i64: 16, 256>}, {transform_indices = @transform_1, window_bounds = array<i64: 256, 256>}, {transform_indices = @transform_2, window_bounds = array<i64: 16, 256>}]} {
    %c0_i32 = arith.constant 0 : i32
    %0 = arith.cmpi eq, %arg2, %c0_i32 : i32
    %1 = arith.extui %0 : i1 to i32
    %c0_i32_0 = arith.constant 0 : i32
    %2 = arith.cmpi ne, %1, %c0_i32_0 : i32
    scf.if %2 {
      %cst_10 = arith.constant 0.000000e+00 : f32
      %12 = vector.broadcast %cst_10 : f32 to vector<16x256xf32>
      %c0_11 = arith.constant 0 : index
      %c0_12 = arith.constant 0 : index
      %13 = vector.load %arg6[%c0_11, %c0_12] : memref<16x256xf32, #tpu.memory_space<vmem>>, vector<16x256xf32>
      tpu.vector_store %arg6[%c0_11, %c0_12], %12 {strides = array<i32>} : memref<16x256xf32, #tpu.memory_space<vmem>>, vector<16x256xf32>,
    } else {
    }
    %c0 = arith.constant 0 : index
    %c0_1 = arith.constant 0 : index
    %3 = vector.load %arg6[%c0, %c0_1] : memref<16x256xf32, #tpu.memory_space<vmem>>, vector<16x256xf32>
    %c0_2 = arith.constant 0 : index
    %c0_3 = arith.constant 0 : index
    %4 = vector.load %arg3[%c0_2, %c0_3] : memref<16x256xf32, #tpu.memory_space<vmem>>, vector<16x256xf32>
    %c0_4 = arith.constant 0 : index
    %c0_5 = arith.constant 0 : index
    %5 = vector.load %arg4[%c0_4, %c0_5] : memref<256x256xf32, #tpu.memory_space<vmem>>, vector<256x256xf32>
    %cst = arith.constant dense<0.000000e+00> : vector<16x256xf32>
    %6 = tpu.matmul %4, %5, %cst {dimension_numbers = #tpu.dot_dimension_numbers<[1], [0], [0], [1], [0, 0, 1, 1], [], []>, precision = #tpu.contract_precision<fp32>} : vector<16x256xf32>, vector<256x256xf32>, vector<16x256xf32> -> vector<16x256xf32>
    %7 = arith.addf %3, %6 : vector<16x256xf32>
    %c0_6 = arith.constant 0 : index
    %c0_7 = arith.constant 0 : index
    %8 = vector.load %arg6[%c0_6, %c0_7] : memref<16x256xf32, #tpu.memory_space<vmem>>, vector<16x256xf32>
    tpu.vector_store %arg6[%c0_6, %c0_7], %7 {strides = array<i32>} : memref<16x256xf32, #tpu.memory_space<vmem>>, vector<16x256xf32>,
    %c0_i32_8 = arith.constant 0 : i32
    %9 = arith.cmpi eq, %arg2, %c0_i32_8 : i32
    %10 = arith.extui %9 : i1 to i32
    %c0_i32_9 = arith.constant 0 : i32
    %11 = arith.cmpi ne, %10, %c0_i32_9 : i32
    scf.if %11 {
      %c0_10 = arith.constant 0 : index
      %c0_11 = arith.constant 0 : index
      %12 = vector.load %arg6[%c0_10, %c0_11] : memref<16x256xf32, #tpu.memory_space<vmem>>, vector<16x256xf32>
      %c0_12 = arith.constant 0 : index
      %c0_13 = arith.constant 0 : index
      %13 = vector.load %arg5[%c0_12, %c0_13] : memref<16x256xf32, #tpu.memory_space<vmem>>, vector<16x256xf32>
      tpu.vector_store %arg5[%c0_12, %c0_13], %12 {strides = array<i32>} : memref<16x256xf32, #tpu.memory_space<vmem>>, vector<16x256xf32>,
    } else {
    }
    return
  }
  func.func @transform_0(%arg0: i32, %arg1: i32, %arg2: i32) -> (i32, i32) {
    %c0_i32 = arith.constant 0 : i32
    return %arg0, %arg2 : i32, i32
  }
  func.func @transform_1(%arg0: i32, %arg1: i32, %arg2: i32) -> (i32, i32) {
    %c0_i32 = arith.constant 0 : i32
    return %arg2, %arg1 : i32, i32
  }
  func.func @transform_2(%arg0: i32, %arg1: i32, %arg2: i32) -> (i32, i32) {
    %c0_i32 = arith.constant 0 : i32
    return %arg0, %arg1 : i32, i32
  }
}

</mosaic_0001>

<bundles_post_ra>
// kernel: tpu_custom_call.1
= control target key start
LH: loop header
LB: loop body
LE: loop exit
PB: predicated region body
PF: predicated region fallthrough
CT: control target
= control target key end

     0   :  { %7 = vsyncpa [#allocation4], 0  ;;  %s3558_s0 = inlined_call_operand.hbm [shape: f32[16,256], index: 0, kind: input, shape index: {}]   ;;  %s3559_s1 = inlined_call_operand.hbm [shape: f32[256,768], index: 1, kind: input, shape index: {}]   ;;  %s3560_s2 = inlined_call_operand.hbm [shape: f32[16,768], index: 2, kind: output, shape index: {}]  }
   0x1   :  { %8 = vsyncpa [#allocation7], 0 }
   0x2   :  { %10 = vsyncpa [#allocation7 + $0x1], 0 }
   0x3   :  { %11 = vsyncpa [#allocation5], 0 }
   0x4   :  { %13 = vsyncpa [#allocation5 + $0x1], 0  ;;  %s2463_s9 = smov 0   ;;  %s2465_s10 = smov 0  }
   0x5   :  { %s2467_s11 = smov 0   ;;  %s2469_s12 = smov 0  }
   0x6   :  { %s2471_s13 = smov 0   ;;  %s2473_s14 = smov 0  }
   0x7 LB: > { %s1791_s15 = sadd.s32 4294967295, %s2437_s14   ;;  %s1792_s16 = sadd.s32 4294967294, %s2437_s14   ;;  %s2437_s14 = sphi %s2473_s14, %s19_s14   ;;  %s2433_s13 = sphi %s2471_s13, %s3984_s13   ;;  %s2429_s12 = sphi %s2469_s12, %s3983_s12   ;;  %s2425_s11 = sphi %s2467_s11, %s3982_s11   ;;  %s2421_s10 = sphi %s2465_s10, %s3981_s10   ;;  %s2417_s9 = sphi %s2463_s9, %s3980_s9  }
   0x8   : > { %p82_p0 = scmp.ne.s32.totalorder %s2425_s11, %s2421_s10  ;;  %p83_p1 = scmp.eq.s32.totalorder %s2437_s14, 0 }
   0x9   : > { %p88_p2 = scmp.ne.s32.totalorder %s2421_s10, %s2417_s9  ;;  %p2500_p3 = scmp.eq.s32.totalorder %s1791_s15, 0 }
   0xa   : > { %p2504_p4 = por %p83_p1, %p82_p0  ;;  %p114_p5 = scmp.eq.s32.totalorder %s1791_s15, 2 }
   0xb   : > { %s3707_s17 = scalar_select %p2500_p3, 1, 0 }
   0xc   : > { %p2510_p6 = por %p2500_p3, %p88_p2  ;;  %p120_p7 = scmp.eq.s32.totalorder %s1792_s16, 2 }
   0xd   : > { %p2514_p8 = por %p114_p5, %p82_p0  ;;  %p1793_p9 = scmp.ge.s32.totalorder %s2437_s14, 1 }
   0xe   : > { %s3709_s19 = scalar_select %p2510_p6, 1, 0 }
   0xf   : > { %s3710_s20 = scalar_select %p2514_p8, 1, 0 }
  0x10   : > { %p2519_p10 = por %p120_p7, %p88_p2  ;;  %p127_p11 = scmp.lt.s32.totalorder %s2437_s14, 4 }
  0x11   : > { %s2439_s23 = smov [#allocation3]   ;;  %p2235_p0 = scmp.lt.s32.totalorder %s2437_s14, 3 }
  0x12   : > { %s3711_s21 = scalar_select %p2519_p10, 1, 0 }
  0x13   : > { %p2524_p12 = pnand %p1793_p9, %p127_p11  ;;  %s145_s24 = sshll.u32 %s2439_s23, 4  ;;  %s146_s24 = int_to_ptr.vmem [resolvable:$true] %s145_s24 }
  0x14   : > { %p2539_p2 = pnand %p2235_p0, %p2504_p4  ;;  %s34_s27 = sadd.s32 1, %s2433_s13 }
  0x15   : > { %s3712_s22 = scalar_select %p2524_p12, 1, 0 }
  0x16   : > { %p2222_p13 = pneg %p2524_p12  ;;  %s2293_s30 = scalar_lea.hbm %s3558_s0, 512 }
  0x17   : > { %s3714_s26 = scalar_select %p2539_p2, 1, 0 }
  0x18   : > { %p2533_p1 = pnand %p2222_p13, %p2500_p3  ;;  %p2294_p5 = scmp.ne.s32.totalorder %s3558_s0, %s2293_s30 }
  0x19   : > { %p2300_p4 = scmp.lt.u32.totalorder %s2293_s30, %s3558_s0 }
  0x1a   : > { %p2295_p7 = pneg %p2533_p1 }
  0x1c   : > { %p2296_p9 = pnand %p2295_p7, %p2294_p5 }
  0x1e   : > { %p2297_p11 = pneg %p2296_p9 }
  0x20   : > { %p2302_p13 = pnand %p2300_p4, %p2297_p11 }
  0x22   : > { %2305 = shalt.err (!%p2302_p13)
}
  0x23   : > { %s2306_s7 = scalar_lea.vmem %s146_s24, 512  ;;  %p2314_p6 = scmp.lt.s32.totalorder %s146_s24, %s146_s24 }
  0x24   : > { %p2307_p0 = scmp.ne.s32.totalorder %s146_s24, %s2306_s7  ;;  %p2315_p3 = scmp.lt.s32.totalorder %s2306_s7, %s2306_s7 }
  0x26   : > { %p2309_p10 = pnand %p2307_p0, %p2295_p7  ;;  %p2316_p12 = por %p2315_p3, %p2314_p6 }
  0x28   : > { %p2310_p8 = pneg %p2309_p10 }
  0x2a   : > { %p2317_p2 = pnand %p2316_p12, %p2310_p8 }
  0x2c   : > { %2320 = shalt.err (!%p2317_p2)
}
  0x2d   : > { %s2440_s8 = smov 256   ;;  %s2441_s15 = smov 16  }
  0x2e   : > { %2225 = dma.hbm_to_vmem [thread:$0]  (!%p2533_p1), %s3558_s0, 512, %s146_s24, [#allocation4], %s2440_s8, %s2440_s8, %s2441_s15  }
  0x2f   : > { %p36_p10 = scmp.ge.s32.totalorder %s34_s27, 3  ;;  %s75_s23 = sadd.s32 1, %s2425_s11 }
  0x30   : > { %s159_s28 = sand.u32 1, %s2425_s11   ;;  %s1808_s3 = sshll.u32 %s2433_s13, 8 }
  0x31   : > { %s3986_s27 = smov (%p36_p10, %s34_s27), 0  ;;  %s1796_s29 = sshll.u32 %s159_s28, 9 }
  0x32   : > { %s71_s30 = ssub.s32 %s2433_s13, %s3986_s27  ;;  %s2573_s5 = scalar_lea.hbm %s3559_s1, %s1808_s3 }
  0x33   : > { %p73_p3 = scmp.eq.s32.totalorder %s71_s30, 0  ;;  %s163_s24 = scalar_lea.vmem [#allocation6], %s1796_s29 }
  0x34   : > { %s173_s6 = sshll.u32 %s163_s24, 4  ;;  %s2580_s16 = scalar_lea.sflag [#allocation7], %s159_s28  ;;  %s2578_s6 = int_to_ptr.vmem [resolvable:$true] %s173_s6 }
  0x35   : > { %s2576_s7 = scalar_select %p73_p3, %s2425_s11, %s75_s23  }
  0x36   : > { %s2321_s18 = scalar_lea.hbm %s2573_s5, 8192  ;;  %p3715_p8 = scmp.ne.s32.totalorder %s3714_s26, 0 }
  0x37   : > { %p2322_p6 = scmp.ne.s32.totalorder %s2573_s5, %s2321_s18  ;;  %s2326_s25 = scalar_lea.hbm %s3559_s1, 24576 }
  0x38   : > { %p2323_p12 = pneg %p3715_p8  ;;  %p2327_p5 = scmp.lt.u32.totalorder %s2573_s5, %s3559_s1 }
  0x39   : > { %p2328_p7 = scmp.lt.u32.totalorder %s2326_s25, %s2321_s18  ;;  %p2330_p11 = scmp.lt.u32.totalorder %s2321_s18, %s2573_s5 }
  0x3a   : > { %p2324_p1 = pnand %p2323_p12, %p2322_p6 }
  0x3b   : > { %p2329_p9 = por %p2328_p7, %p2327_p5 }
  0x3c   : > { %p2325_p2 = pneg %p2324_p1 }
  0x3d   : > { %p2331_p4 = por %p2330_p11, %p2329_p9 }
  0x3f   : > { %p2332_p13 = pnand %p2331_p4, %p2325_p2 }
  0x41   : > { %2335 = shalt.err (!%p2332_p13)
}
  0x42   : > { %s2336_s23 = scalar_lea.vmem %s2578_s6, 8192  ;;  %s2442_s28 = smov [#allocation6]  }
  0x43   : > { %p2337_p0 = scmp.ne.s32.totalorder %s2578_s6, %s2336_s23  ;;  %s2341_s24 = sshll.u32 %s2442_s28, 4  ;;  %s2342_s24 = int_to_ptr.vmem [resolvable:$false] %s2341_s24 }
  0x44   : > { %s2343_s30 = scalar_lea.vmem %s2342_s24, 16384  ;;  %p2344_p6 = scmp.lt.s32.totalorder %s2578_s6, %s2342_s24 }
  0x45   : > { %p2339_p10 = pnand %p2337_p0, %p2323_p12  ;;  %p2345_p1 = scmp.lt.s32.totalorder %s2343_s30, %s2336_s23 }
  0x47   : > { %p2340_p3 = pneg %p2339_p10  ;;  %p2346_p5 = por %p2345_p1, %p2344_p6 }
  0x49   : > { %p2347_p7 = pnand %p2346_p5, %p2340_p3 }
  0x4b   : > { %2350 = shalt.err (!%p2347_p7)
}
  0x4c   : > { %s2443_s18 = smov 768   ;;  %p3716_p12 = scmp.ne.s32.totalorder %s3712_s22, 0 }
  0x4d   : > { %2229 = dma.hbm_to_vmem [thread:$0]  (!%p3715_p8), %s2573_s5, 8192, %s2578_s6, %s2580_s16, %s2443_s18, %s2440_s8, %s2441_s15  }
  0x4e   : > { %185 = sbr.rel (%p3716_p12) target bundleno = 527 (0x20f), region = 28 }
  0x55   : > { %p3717_p2 = scmp.ne.s32.totalorder %s3707_s17, 0 }
  0x57   : > { %2404 = dma.done.wait (%p3717_p2), [#allocation4], 512  }
  0x58   : > { %2406 = vsyncadd (%p3717_p2), [#allocation4], 4294966784  ;;  %s2617_s3 = sand.u32 1, %s2421_s10   ;;  %p3718_p8 = scmp.ne.s32.totalorder %s3709_s19, 0 }
  0x59   : > { %s1801_s26 = sshll.u32 %s2617_s3, 9  ;;  %s192_s25 = scalar_lea.sflag [#allocation7], %s2617_s3 }
  0x5a   : > { %s2621_s29 = scalar_lea.vmem [#allocation6], %s1801_s26 }
  0x5b   : > { %2408 = dma.done.wait (%p3718_p8), %s192_s25, 8192  }
  0x5c   : > { %2410 = vsyncadd (%p3718_p8), %s192_s25, 4294959104  ;;  %v239_v0 = vld [vmem:[%s2621_s29 + $0x8] sm:$0xff]  ;;  %v241_v1 = vld [vmem:[%s2621_s29 + $0x18] sm:$0xff]  ;;  %s1802_s17 = sshll.u32 %s2617_s3, 5  ;;  %s1809_s8 = sshll.u32 %s2429_s12, 8 }
  0x5d   : > { %v238_v2 = vld [vmem:[%s2621_s29] sm:$0xff]  ;;  %v302_v3 = vand.u32 4294901760, %v239_v0  ;;  %v306_v4 = vand.u32 4294901760, %v241_v1  ;;  %v240_v5 = vld [vmem:[%s2621_s29 + $0x10] sm:$0xff]  ;;  %v243_v7 = vld [vmem:[%s2621_s29 + $0x28] sm:$0xff]  ;;  %s215_s19 = scalar_lea.vmem [#allocation8], %s1802_s17  ;;  %s3510_s6 = scalar_lea.hbm %s3560_s2, %s1809_s8 }
  0x5e   : > { %v304_v6 = vand.u32 4294901760, %v238_v2  ;;  %v245_v8 = vld [vmem:[%s2621_s29 + $0x38] sm:$0xff]  ;;  %v308_v9 = vand.u32 4294901760, %v240_v5  ;;  %v310_v10 = vand.u32 4294901760, %v243_v7  ;;  %v242_v12 = vld [vmem:[%s2621_s29 + $0x20] sm:$0xff]  ;;  %v244_v13 = vld [vmem:[%s2621_s29 + $0x30] sm:$0xff] }
  0x5f   : > { %v314_v11 = vand.u32 4294901760, %v245_v8  ;;  %v247_v14 = vld [vmem:[%s2621_s29 + $0x48] sm:$0xff]  ;;  %v2636_v15 = vpack.c.bf16 %v306_v4, %v302_v3  ;;  %v249_v16 = vld [vmem:[%s2621_s29 + $0x58] sm:$0xff]  ;;  %v246_v17 = vld [vmem:[%s2621_s29 + $0x40] sm:$0xff]  ;;  %v312_v23 = vand.u32 4294901760, %v242_v12  ;;  %v316_v24 = vand.u32 4294901760, %v244_v13 }
  0x60   : > { %v248_v18 = vld [vmem:[%s2621_s29 + $0x50] sm:$0xff]  ;;  %v2641_v19 = vpack.c.bf16 %v308_v9, %v304_v6  ;;  %v251_v21 = vld [vmem:[%s2621_s29 + $0x68] sm:$0xff]  ;;  %v253_v22 = vld [vmem:[%s2621_s29 + $0x78] sm:$0xff]  ;;  %v318_v25 = vand.u32 4294901760, %v247_v14  ;;  %v2649_v26 = vsub.f32 %v239_v0, %v302_v3  ;;  %v322_v27 = vand.u32 4294901760, %v249_v16  ;;  %s1684_s22 = sshll.u32 %s215_s19, 4  ;;  %s3505_s22 = int_to_ptr.vmem [resolvable:$true] %s1684_s22 }
  0x61   : > { %3719 = vst [vmem:[#allocation12_spill] sm:$0xff] %v2636_v15  ;;  %v2643_v20 = vpack.c.bf16 %v314_v11, %v310_v10  ;;  %1811 = vmatprep.subr.bf16.mxu1 %v2636_v15  ;;  %2003 = vmatprep.subr.bf16.mxu0 %v2636_v15  ;;  %v320_v28 = vand.u32 4294901760, %v246_v17  ;;  %v324_v29 = vand.u32 4294901760, %v248_v18  ;;  %v2653_v30 = vsub.f32 %v241_v1, %v306_v4  ;;  %v250_v34 = vld [vmem:[%s2621_s29 + $0x60] sm:$0xff]  ;;  %v252_v35 = vld [vmem:[%s2621_s29 + $0x70] sm:$0xff]  ;;  %v255_v36 = vld [vmem:[%s2621_s29 + $0x88] sm:$0xff] }
  0x62   : > { %3720 = vst [vmem:[#allocation13_spill] sm:$0xff] %v2641_v19  ;;  %3722 = vst [vmem:[#allocation15_spill] sm:$0xff] %v2649_v26  ;;  %1813 = vmatpush1.bf16.msra.mxu1 %v2641_v19  ;;  %2005 = vmatpush1.bf16.msra.mxu0 %v2641_v19  ;;  %v2657_v31 = vpack.c.bf16 %v316_v24, %v312_v23  ;;  %v326_v32 = vand.u32 4294901760, %v251_v21  ;;  %v330_v33 = vand.u32 4294901760, %v253_v22  ;;  %v257_v41 = vld [vmem:[%s2621_s29 + $0x98] sm:$0xff]  ;;  %v254_v42 = vld [vmem:[%s2621_s29 + $0x80] sm:$0xff] }
  0x63   : > { %3721 = vst [vmem:[#allocation14_spill] sm:$0xff] %v2643_v20  ;;  %3723 = vst [vmem:[#allocation16_spill] sm:$0xff] %v2653_v30  ;;  %1815 = vmatprep.subr.bf16.mxu1 %v2643_v20  ;;  %2007 = vmatprep.subr.bf16.mxu0 %v2643_v20  ;;  %v2662_v37 = vsub.f32 %v238_v2, %v304_v6  ;;  %v2664_v38 = vsub.f32 %v240_v5, %v308_v9  ;;  %v256_v43 = vld [vmem:[%s2621_s29 + $0x90] sm:$0xff]  ;;  %v328_v49 = vand.u32 4294901760, %v250_v34  ;;  %v259_v52 = vld [vmem:[%s2621_s29 + $0xa8] sm:$0xff]  ;;  %s1668_s12 = scalar_lea.sflag [#allocation5], %s2617_s3 }
  0x64   : > { %3724 = vst [vmem:[#allocation17_spill] sm:$0xff] %v2657_v31  ;;  %v2666_v39 = vsub.f32 %v243_v7, %v310_v10  ;;  %v2668_v40 = vpack.c.bf16 %v322_v27, %v318_v25  ;;  %v2673_v44 = vsub.f32 %v245_v8, %v314_v11  ;;  %v2675_v45 = vsub.f32 %v242_v12, %v312_v23  ;;  %v261_v57 = vld [vmem:[%s2621_s29 + $0xb8] sm:$0xff]  ;;  %v258_v62 = vld [vmem:[%s2621_s29 + $0xa0] sm:$0xff]  ;;  %v260_v3 = vld [vmem:[%s2621_s29 + $0xb0] sm:$0xff]  ;;  %s2351_s16 = scalar_lea.vmem %s3505_s22, 512  ;;  %p3978_p11 = scmp.ne.s32.totalorder %s3710_s20, 0 }
  0x65   : > { %3725 = vst [vmem:[#allocation18_spill] sm:$0xff] %v2662_v37  ;;  %3726 = vst [vmem:[#allocation19_spill] sm:$0xff] %v2664_v38  ;;  %v2677_v46 = vsub.f32 %v244_v13, %v316_v24  ;;  %v2679_v47 = vsub.f32 %v247_v14, %v318_v25  ;;  %v2683_v48 = vpack.c.bf16 %v324_v29, %v320_v28  ;;  %v332_v50 = vand.u32 4294901760, %v252_v35  ;;  %v263_v4 = vld [vmem:[%s2621_s29 + $0xc8] sm:$0xff]  ;;  %v265_v5 = vld [vmem:[%s2621_s29 + $0xd8] sm:$0xff]  ;;  %p2352_p9 = scmp.ne.s32.totalorder %s3505_s22, %s2351_s16  ;;  %s2444_s4 = smov [#allocation8]  }
  0x66   : > { %3727 = vst [vmem:[#allocation20_spill] sm:$0xff] %v2666_v39  ;;  %3728 = vst [vmem:[#allocation21_spill] sm:$0xff] %v2668_v40  ;;  %1817 = vmatpush1.bf16.msra.mxu1 %v2657_v31  ;;  %2009 = vmatpush1.bf16.msra.mxu0 %v2657_v31  ;;  %v334_v51 = vand.u32 4294901760, %v255_v36  ;;  %v2688_v53 = vpack.c.bf16 %v330_v33, %v326_v32  ;;  %v338_v54 = vand.u32 4294901760, %v257_v41  ;;  %v336_v55 = vand.u32 4294901760, %v254_v42  ;;  %v262_v10 = vld [vmem:[%s2621_s29 + $0xc0] sm:$0xff] }
  0x67   : > { %3729 = vst [vmem:[#allocation22_spill] sm:$0xff] %v2673_v44  ;;  %3730 = vst [vmem:[#allocation23_spill] sm:$0xff] %v2683_v48  ;;  %1819 = vmatprep.subr.bf16.mxu1 %v2668_v40  ;;  %2011 = vmatprep.subr.bf16.mxu0 %v2668_v40  ;;  %v340_v56 = vand.u32 4294901760, %v256_v43  ;;  %v2691_v58 = vsub.f32 %v249_v16, %v322_v27  ;;  %v2693_v59 = vsub.f32 %v246_v17, %v320_v28  ;;  %v264_v11 = vld [vmem:[%s2621_s29 + $0xd0] sm:$0xff]  ;;  %v267_v16 = vld [vmem:[%s2621_s29 + $0xe8] sm:$0xff]  ;;  %p2353_p4 = pnand %p2352_p9, %p3978_p11  ;;  %s2355_s23 = sshll.u32 %s2444_s4, 4  ;;  %s2356_s23 = int_to_ptr.vmem [resolvable:$false] %s2355_s23 }
  0x68   : > { %3731 = vst [vmem:[#allocation24_spill] sm:$0xff] %v2688_v53  ;;  %v2695_v60 = vsub.f32 %v248_v18, %v324_v29  ;;  %v2697_v61 = vsub.f32 %v251_v21, %v326_v32  ;;  %v2700_v63 = vsub.f32 %v253_v22, %v330_v33  ;;  %v2702_v0 = vpack.c.bf16 %v332_v50, %v328_v49  ;;  %v269_v17 = vld [vmem:[%s2621_s29 + $0xf8] sm:$0xff]  ;;  %v266_v24 = vld [vmem:[%s2621_s29 + $0xe0] sm:$0xff]  ;;  %v268_v25 = vld [vmem:[%s2621_s29 + $0xf0] sm:$0xff]  ;;  %s2357_s28 = scalar_lea.vmem %s2356_s23, 1024  ;;  %p2358_p0 = scmp.lt.s32.totalorder %s3505_s22, %s2356_s23 }
  0x69   : > { %3732 = vst [vmem:[#allocation25_spill] sm:$0xff] %v2691_v58  ;;  %v2704_v1 = vsub.f32 %v250_v34, %v328_v49  ;;  %v342_v2 = vand.u32 4294901760, %v259_v52  ;;  %v2711_v6 = vsub.f32 %v252_v35, %v332_v50  ;;  %v2713_v7 = vpack.c.bf16 %v338_v54, %v334_v51  ;;  %v278_v20 = vld [vmem:[%s2621_s29 + $0x140] sm:$0xff]  ;;  %v280_v19 = vld [vmem:[%s2621_s29 + $0x150] sm:$0xff]  ;;  %v283_v15 = vld [vmem:[%s2621_s29 + $0x168] sm:$0xff]  ;;  %p2354_p13 = pneg %p2353_p4  ;;  %p2359_p10 = scmp.lt.s32.totalorder %s2357_s28, %s2351_s16 }
  0x6a   : > { %3733 = vst [vmem:[#allocation26_spill] sm:$0xff] %v2695_v60  ;;  %3734 = vst [vmem:[#allocation27_spill] sm:$0xff] %v2697_v61  ;;  %1821 = vmatpush1.bf16.msra.mxu1 %v2683_v48  ;;  %2013 = vmatpush1.bf16.msra.mxu0 %v2683_v48  ;;  %v2715_v8 = vsub.f32 %v255_v36, %v334_v51  ;;  %v346_v9 = vand.u32 4294901760, %v261_v57  ;;  %v2721_v12 = vsub.f32 %v257_v41, %v338_v54  ;;  %v271_v36 = vld [vmem:[%s2621_s29 + $0x108] sm:$0xff]  ;;  %v273_v41 = vld [vmem:[%s2621_s29 + $0x118] sm:$0xff] }
  0x6b   : > { %3735 = vst [vmem:[#allocation28_spill] sm:$0xff] %v2700_v63  ;;  %3736 = vst [vmem:[#allocation29_spill] sm:$0xff] %v2702_v0  ;;  %1823 = vmatprep.subr.bf16.mxu1 %v2688_v53  ;;  %2015 = vmatprep.subr.bf16.mxu0 %v2688_v53  ;;  %v2723_v13 = vpack.c.bf16 %v340_v56, %v336_v55  ;;  %v2725_v14 = vsub.f32 %v254_v42, %v336_v55  ;;  %v344_v18 = vand.u32 4294901760, %v258_v62  ;;  %v270_v51 = vld [vmem:[%s2621_s29 + $0x100] sm:$0xff]  ;;  %v277_v53 = vld [vmem:[%s2621_s29 + $0x138] sm:$0xff]  ;;  %p2360_p3 = por %p2359_p10, %p2358_p0 }
  0x6c   : > { %3737 = vst [vmem:[#allocation30_spill] sm:$0xff] %v2704_v1  ;;  %3738 = vst [vmem:[#allocation31_spill] sm:$0xff] %v2711_v6  ;;  %v348_v21 = vand.u32 4294901760, %v260_v3  ;;  %v350_v22 = vand.u32 4294901760, %v263_v4  ;;  %v354_v23 = vand.u32 4294901760, %v265_v5  ;;  %v2731_v27 = vsub.f32 %v256_v43, %v340_v56 }
  0x6d   : > { %3739 = vst [vmem:[#allocation32_spill] sm:$0xff] %v2713_v7  ;;  %3740 = vst [vmem:[#allocation33_spill] sm:$0xff] %v2715_v8  ;;  %v2733_v28 = vsub.f32 %v259_v52, %v342_v2  ;;  %v352_v29 = vand.u32 4294901760, %v262_v10  ;;  %v356_v32 = vand.u32 4294901760, %v264_v11  ;;  %v2737_v33 = vpack.c.bf16 %v346_v9, %v342_v2  ;;  %p2361_p6 = pnand %p2360_p3, %p2354_p13 }
  0x6e   : > { %3741 = vst [vmem:[#allocation34_spill] sm:$0xff] %v2721_v12  ;;  %3742 = vst [vmem:[#allocation35_spill] sm:$0xff] %v2723_v13  ;;  %1825 = vmatpush1.bf16.msra.mxu1 %v2702_v0  ;;  %2017 = vmatpush1.bf16.msra.mxu0 %v2702_v0  ;;  %v2739_v34 = vsub.f32 %v261_v57, %v346_v9  ;;  %v2741_v35 = vsub.f32 %v258_v62, %v344_v18  ;;  %v358_v42 = vand.u32 4294901760, %v267_v16  ;;  %v272_v57 = vld [vmem:[%s2621_s29 + $0x110] sm:$0xff]  ;;  %v275_v0 = vld [vmem:[%s2621_s29 + $0x128] sm:$0xff] }
  0x6f   : > { %3743 = vst [vmem:[#allocation36_spill] sm:$0xff] %v2725_v14  ;;  %3744 = vst [vmem:[#allocation37_spill] sm:$0xff] %v2731_v27  ;;  %1827 = vmatprep.subr.bf16.mxu1 %v2713_v7  ;;  %2019 = vmatprep.subr.bf16.mxu0 %v2713_v7  ;;  %v362_v43 = vand.u32 4294901760, %v269_v17  ;;  %v360_v49 = vand.u32 4294901760, %v266_v24  ;;  %v364_v50 = vand.u32 4294901760, %v268_v25  ;;  %v2748_v52 = vpack.c.bf16 %v348_v21, %v344_v18 }
  0x70   : > { %3745 = vst [vmem:[#allocation38_spill] sm:$0xff] %v2733_v28  ;;  %3746 = vst [vmem:[#allocation39_spill] sm:$0xff] %v2737_v33  ;;  %v2750_v54 = vsub.f32 %v260_v3, %v348_v21  ;;  %v2752_v55 = vpack.c.bf16 %v354_v23, %v350_v22  ;;  %v2754_v56 = vsub.f32 %v263_v4, %v350_v22  ;;  %v366_v9 = vand.u32 4294901760, %v271_v36  ;;  %v274_v21 = vld [vmem:[%s2621_s29 + $0x120] sm:$0xff]  ;;  %v276_v22 = vld [vmem:[%s2621_s29 + $0x130] sm:$0xff] }
  0x71   : > { %3747 = vst [vmem:[#allocation40_spill] sm:$0xff] %v2739_v34  ;;  %3748 = vst [vmem:[#allocation41_spill] sm:$0xff] %v2741_v35  ;;  %v2757_v62 = vsub.f32 %v265_v5, %v354_v23  ;;  %v2759_v2 = vpack.c.bf16 %v356_v32, %v352_v29  ;;  %v370_v7 = vand.u32 4294901760, %v273_v41  ;;  %v2765_v3 = vsub.f32 %v262_v10, %v352_v29  ;;  %v281_v29 = vld [vmem:[%s2621_s29 + $0x158] sm:$0xff] }
  0x72   : > { %3749 = vst [vmem:[#allocation42_spill] sm:$0xff] %v2748_v52  ;;  %3750 = vst [vmem:[#allocation43_spill] sm:$0xff] %v2750_v54  ;;  %1829 = vmatpush1.bf16.msra.mxu1 %v2723_v13  ;;  %2021 = vmatpush1.bf16.msra.mxu0 %v2723_v13  ;;  %v2767_v18 = vsub.f32 %v264_v11, %v356_v32  ;;  %v2769_v4 = vsub.f32 %v267_v16, %v358_v42  ;;  %v368_v5 = vand.u32 4294901760, %v270_v51  ;;  %v279_v16 = vld [vmem:[%s2621_s29 + $0x148] sm:$0xff] }
  0x73   : > { %3751 = vst [vmem:[#allocation44_spill] sm:$0xff] %v2752_v55  ;;  %3752 = vst [vmem:[#allocation45_spill] sm:$0xff] %v2754_v56  ;;  %1831 = vmatprep.subr.bf16.mxu1 %v2737_v33  ;;  %2023 = vmatprep.subr.bf16.mxu0 %v2737_v33  ;;  %v2775_v23 = vpack.c.bf16 %v362_v43, %v358_v42  ;;  %v2777_v48 = vsub.f32 %v269_v17, %v362_v43  ;;  %v372_v11 = vand.u32 4294901760, %v272_v57 }
  0x74   : > { %3753 = vst [vmem:[#allocation46_spill] sm:$0xff] %v2757_v62  ;;  %3754 = vst [vmem:[#allocation47_spill] sm:$0xff] %v2759_v2  ;;  %v2779_v10 = vpack.c.bf16 %v364_v50, %v360_v49  ;;  %v2783_v32 = vsub.f32 %v266_v24, %v360_v49  ;;  %v2785_v13 = vsub.f32 %v268_v25, %v364_v50  ;;  %v374_v40 = vand.u32 4294901760, %v275_v0 }
  0x75   : > { %3755 = vst [vmem:[#allocation48_spill] sm:$0xff] %v2765_v3  ;;  %3756 = vst [vmem:[#allocation49_spill] sm:$0xff] %v2767_v18  ;;  %v378_v31 = vand.u32 4294901760, %v277_v53  ;;  %v2789_v33 = vpack.c.bf16 %v370_v7, %v366_v9  ;;  %v2791_v42 = vsub.f32 %v271_v36, %v366_v9  ;;  %v376_v17 = vand.u32 4294901760, %v274_v21  ;;  %v293_v18 = vld [vmem:[%s2621_s29 + $0x1b8] sm:$0xff] }
  0x76   : > { %3757 = vst [vmem:[#allocation50_spill] sm:$0xff] %v2769_v4  ;;  %3758 = vst [vmem:[#allocation51_spill] sm:$0xff] %v2775_v23  ;;  %v380_v43 = vand.u32 4294901760, %v276_v22  ;;  %1833 = vmatpush1.bf16.msra.mxu1 %v2748_v52  ;;  %2025 = vmatpush1.bf16.msra.mxu0 %v2748_v52  ;;  %v2797_v24 = vsub.f32 %v273_v41, %v370_v7  ;;  %v2799_v25 = vsub.f32 %v270_v51, %v368_v5  ;;  %v282_v52 = vld [vmem:[%s2621_s29 + $0x160] sm:$0xff]  ;;  %v284_v7 = vld [vmem:[%s2621_s29 + $0x170] sm:$0xff] }
  0x77   : > { %3759 = vst [vmem:[#allocation52_spill] sm:$0xff] %v2777_v48  ;;  %3760 = vst [vmem:[#allocation53_spill] sm:$0xff] %v2779_v10  ;;  %v285_v48 = vld [vmem:[%s2621_s29 + $0x178] sm:$0xff]  ;;  %v382_v49 = vand.u32 4294901760, %v279_v16  ;;  %v386_v50 = vand.u32 4294901760, %v281_v29  ;;  %1835 = vmatprep.subr.bf16.mxu1 %v2752_v55  ;;  %2027 = vmatprep.subr.bf16.mxu0 %v2752_v55  ;;  %v2803_v36 = vpack.c.bf16 %v372_v11, %v368_v5 }
  0x78   : > { %3761 = vst [vmem:[#allocation54_spill] sm:$0xff] %v2783_v32  ;;  %3762 = vst [vmem:[#allocation55_spill] sm:$0xff] %v2785_v13  ;;  %v2805_v9 = vsub.f32 %v272_v57, %v372_v11  ;;  %v388_v13 = vand.u32 4294901760, %v280_v19  ;;  %v2809_v41 = vpack.c.bf16 %v378_v31, %v374_v40  ;;  %v2811_v51 = vsub.f32 %v275_v0, %v374_v40  ;;  %v287_v32 = vld [vmem:[%s2621_s29 + $0x188] sm:$0xff]  ;;  %v289_v55 = vld [vmem:[%s2621_s29 + $0x198] sm:$0xff] }
  0x79   : > { %3763 = vst [vmem:[#allocation56_spill] sm:$0xff] %v2789_v33  ;;  %3764 = vst [vmem:[#allocation57_spill] sm:$0xff] %v2791_v42  ;;  %v384_v42 = vand.u32 4294901760, %v278_v20  ;;  %v2815_v5 = vsub.f32 %v277_v53, %v378_v31  ;;  %v2817_v4 = vpack.c.bf16 %v380_v43, %v376_v17  ;;  %v2819_v57 = vsub.f32 %v274_v21, %v376_v17  ;;  %v288_v53 = vld [vmem:[%s2621_s29 + $0x190] sm:$0xff] }
  0x7a   : > { %3765 = vst [vmem:[#allocation58_spill] sm:$0xff] %v2797_v24  ;;  %3766 = vst [vmem:[#allocation59_spill] sm:$0xff] %v2799_v25  ;;  %v390_v25 = vand.u32 4294901760, %v283_v15  ;;  %v394_v24 = vand.u32 4294901760, %v285_v48  ;;  %v2821_v11 = vsub.f32 %v276_v22, %v380_v43  ;;  %1837 = vmatpush1.bf16.msra.mxu1 %v2759_v2  ;;  %2029 = vmatpush1.bf16.msra.mxu0 %v2759_v2  ;;  %v396_v31 = vand.u32 4294901760, %v284_v7 }
  0x7b   : > { %3767 = vst [vmem:[#allocation60_spill] sm:$0xff] %v2803_v36  ;;  %3768 = vst [vmem:[#allocation61_spill] sm:$0xff] %v2805_v9  ;;  %v286_v9 = vld [vmem:[%s2621_s29 + $0x180] sm:$0xff]  ;;  %v2826_v40 = vpack.c.bf16 %v386_v50, %v382_v49  ;;  %v2828_v0 = vsub.f32 %v279_v16, %v382_v49  ;;  %1839 = vmatprep.subr.bf16.mxu1 %v2775_v23  ;;  %2031 = vmatprep.subr.bf16.mxu0 %v2775_v23  ;;  %v398_v17 = vand.u32 4294901760, %v287_v32 }
  0x7c   : > { %3769 = vst [vmem:[#allocation62_spill] sm:$0xff] %v2809_v41  ;;  %3770 = vst [vmem:[#allocation63_spill] sm:$0xff] %v2811_v51  ;;  %v392_v51 = vand.u32 4294901760, %v282_v52  ;;  %v2835_v21 = vsub.f32 %v281_v29, %v386_v50  ;;  %v2837_v22 = vpack.c.bf16 %v388_v13, %v384_v42  ;;  %v402_v16 = vand.u32 4294901760, %v289_v55  ;;  %v295_v50 = vld [vmem:[%s2621_s29 + $0x1c8] sm:$0xff] }
  0x7d   : > { %3771 = vst [vmem:[#allocation64_spill] sm:$0xff] %v2815_v5  ;;  %3772 = vst [vmem:[#allocation65_spill] sm:$0xff] %v2817_v4  ;;  %v291_v5 = vld [vmem:[%s2621_s29 + $0x1a8] sm:$0xff]  ;;  %v2839_v43 = vsub.f32 %v278_v20, %v384_v42  ;;  %v2841_v49 = vsub.f32 %v280_v19, %v388_v13  ;;  %v2843_v2 = vpack.c.bf16 %v394_v24, %v390_v25  ;;  %v400_v3 = vand.u32 4294901760, %v286_v9 }
  0x7e   : > { %3773 = vst [vmem:[#allocation66_spill] sm:$0xff] %v2819_v57  ;;  %3774 = vst [vmem:[#allocation67_spill] sm:$0xff] %v2821_v11  ;;  %v290_v11 = vld [vmem:[%s2621_s29 + $0x1a0] sm:$0xff]  ;;  %v292_v57 = vld [vmem:[%s2621_s29 + $0x1b0] sm:$0xff]  ;;  %v404_v62 = vand.u32 4294901760, %v288_v53  ;;  %v406_v23 = vand.u32 4294901760, %v291_v5  ;;  %1841 = vmatpush1.bf16.msra.mxu1 %v2779_v10  ;;  %2033 = vmatpush1.bf16.msra.mxu0 %v2779_v10  ;;  %v2853_v19 = vsub.f32 %v285_v48, %v394_v24 }
  0x7f   : > { %3775 = vst [vmem:[#allocation68_spill] sm:$0xff] %v2826_v40  ;;  %3776 = vst [vmem:[#allocation69_spill] sm:$0xff] %v2828_v0  ;;  %v2845_v0 = vsub.f32 %v283_v15, %v390_v25  ;;  %v410_v29 = vand.u32 4294901760, %v293_v18  ;;  %v2855_v20 = vpack.c.bf16 %v396_v31, %v392_v51  ;;  %v2857_v15 = vsub.f32 %v282_v52, %v392_v51 }
  0x80   : > { %3777 = vst [vmem:[#allocation70_spill] sm:$0xff] %v2835_v21  ;;  %3778 = vst [vmem:[#allocation71_spill] sm:$0xff] %v2837_v22  ;;  %v297_v21 = vld [vmem:[%s2621_s29 + $0x1d8] sm:$0xff]  ;;  %1843 = vmatprep.subr.bf16.mxu1 %v2789_v33  ;;  %2035 = vmatprep.subr.bf16.mxu0 %v2789_v33  ;;  %v2861_v13 = vsub.f32 %v284_v7, %v396_v31  ;;  %v2863_v42 = vpack.c.bf16 %v402_v16, %v398_v17  ;;  %v408_v25 = vand.u32 4294901760, %v290_v11  ;;  %v299_v31 = vld [vmem:[%s2621_s29 + $0x1e8] sm:$0xff] }
  0x81   : > { %3779 = vst [vmem:[#allocation72_spill] sm:$0xff] %v2839_v43  ;;  %3780 = vst [vmem:[#allocation73_spill] sm:$0xff] %v2841_v49  ;;  %v294_v49 = vld [vmem:[%s2621_s29 + $0x1c0] sm:$0xff]  ;;  %v296_v43 = vld [vmem:[%s2621_s29 + $0x1d0] sm:$0xff]  ;;  %v2867_v10 = vsub.f32 %v287_v32, %v398_v17  ;;  %v2869_v48 = vsub.f32 %v289_v55, %v402_v16  ;;  %v414_v24 = vand.u32 4294901760, %v295_v50  ;;  %v418_v52 = vand.u32 4294901760, %v297_v21 }
  0x82   : > { %3781 = vst [vmem:[#allocation74_spill] sm:$0xff] %v2843_v2  ;;  %3782 = vst [vmem:[#allocation75_spill] sm:$0xff] %v2845_v0  ;;  %v412_v0 = vand.u32 4294901760, %v292_v57  ;;  %v2871_v51 = vpack.c.bf16 %v404_v62, %v400_v3  ;;  %v2877_v7 = vpack.c.bf16 %v410_v29, %v406_v23  ;;  %v235_v33 = vld [vmem:[#allocation3 + $0x8] sm:$0xff]  ;;  %1845 = vmatpush1.bf16.msra.mxu1 %v2803_v36  ;;  %2037 = vmatpush1.bf16.msra.mxu0 %v2803_v36 }
  0x83   : > { %3783 = vst [vmem:[#allocation76_spill] sm:$0xff] %v2853_v19  ;;  %3784 = vst [vmem:[#allocation77_spill] sm:$0xff] %v2855_v20  ;;  %v2875_v19 = vsub.f32 %v288_v53, %v404_v62  ;;  %v2882_v32 = vsub.f32 %v291_v5, %v406_v23  ;;  %v2884_v55 = vsub.f32 %v293_v18, %v410_v29  ;;  %v416_v17 = vand.u32 4294901760, %v294_v49  ;;  %v301_v53 = vld [vmem:[%s2621_s29 + $0x1f8] sm:$0xff] }
  0x84   : > { %3785 = vst [vmem:[#allocation78_spill] sm:$0xff] %v2857_v15  ;;  %3786 = vst [vmem:[#allocation79_spill] sm:$0xff] %v2861_v13  ;;  %v2873_v15 = vsub.f32 %v286_v9, %v400_v3  ;;  %v420_v16 = vand.u32 4294901760, %v296_v43  ;;  %1847 = vmatprep.subr.bf16.mxu1 %v2809_v41  ;;  %2039 = vmatprep.subr.bf16.mxu0 %v2809_v41  ;;  %v2888_v62 = vpack.c.bf16 %v412_v0, %v408_v25 }
  0x85   : > { %3787 = vst [vmem:[#allocation80_spill] sm:$0xff] %v2863_v42  ;;  %3788 = vst [vmem:[#allocation81_spill] sm:$0xff] %v2867_v10  ;;  %v2890_v3 = vsub.f32 %v290_v11, %v408_v25  ;;  %v2892_v9 = vsub.f32 %v292_v57, %v412_v0  ;;  %v2895_v23 = vpack.c.bf16 %v418_v52, %v414_v24  ;;  %v422_v5 = vand.u32 4294901760, %v299_v31  ;;  %v298_v0 = vld [vmem:[%s2621_s29 + $0x1e0] sm:$0xff] }
  0x86   : > { %3789 = vst [vmem:[#allocation82_spill] sm:$0xff] %v2869_v48  ;;  %3790 = vst [vmem:[#allocation83_spill] sm:$0xff] %v2871_v51  ;;  %v234_v48 = vld [vmem:[#allocation3] sm:$0xff]  ;;  %v2897_v18 = vsub.f32 %v295_v50, %v414_v24  ;;  %v2899_v29 = vand.u32 4294901760, %v235_v33  ;;  %v2901_v36 = vsub.f32 %v297_v21, %v418_v52  ;;  %v465_v41 = vand.u32 4294901760, %v2649_v26  ;;  %1849 = vmatpush1.bf16.msra.mxu1 %v2817_v4  ;;  %v300_v50 = vld [vmem:[%s2621_s29 + $0x1f0] sm:$0xff] }
  0x87   : > { %3791 = vst [vmem:[#allocation84_spill] sm:$0xff] %v2873_v15  ;;  %3792 = vst [vmem:[#allocation85_spill] sm:$0xff] %v2875_v19  ;;  %2041 = vmatpush1.bf16.msra.mxu0 %v2817_v4  ;;  %v2909_v57 = vpack.c.bf16 %v420_v16, %v416_v17  ;;  %v426_v11 = vand.u32 4294901760, %v301_v53  ;;  %v471_v21 = vand.u32 4294901760, %v2662_v37  ;;  %1851 = vmatprep.subr.bf16.mxu1 %v2826_v40  ;;  %v483_v4 = vand.u32 4294901760, %v2664_v38 }
  0x88   : > { %3793 = vst [vmem:[#allocation86_spill] sm:$0xff] %v2877_v7  ;;  %3794 = vst [vmem:[#allocation87_spill] sm:$0xff] %v2882_v32  ;;  %v2905_v32 = vand.u32 4294901760, %v234_v48  ;;  %v2914_v25 = vsub.f32 %v235_v33, %v2899_v29  ;;  %2043 = vmatprep.subr.bf16.mxu0 %v2826_v40  ;;  %v2919_v24 = vsub.f32 %v294_v49, %v416_v17  ;;  %v428_v19 = vand.u32 4294901760, %v300_v50 }
  0x89   : > { %3795 = vst [vmem:[#allocation88_spill] sm:$0xff] %v2884_v55  ;;  %3796 = vst [vmem:[#allocation89_spill] sm:$0xff] %v2888_v62  ;;  %v477_v55 = vand.u32 4294901760, %v2653_v30  ;;  %v2921_v52 = vsub.f32 %v296_v43, %v420_v16  ;;  %v472_v49 = vsub.f32 %v2662_v37, %v471_v21  ;;  %v489_v43 = vand.u32 4294901760, %v2666_v39 }
  0x8a   : > { %3797 = vst [vmem:[#allocation90_spill] sm:$0xff] %v2890_v3  ;;  %3798 = vst [vmem:[#allocation91_spill] sm:$0xff] %v2892_v9  ;;  %v466_v9 = vsub.f32 %v2649_v26, %v465_v41  ;;  %v424_v3 = vand.u32 4294901760, %v298_v0  ;;  %1853 = vmatpush1.bf16.msra.mxu1 %v2837_v22  ;;  %v484_v40 = vsub.f32 %v2664_v38, %v483_v4  ;;  %v501_v37 = vand.u32 4294901760, %v2673_v44 }
  0x8b   : > { %3799 = vst [vmem:[#allocation92_spill] sm:$0xff] %v2895_v23  ;;  %3800 = vst [vmem:[#allocation93_spill] sm:$0xff] %v2897_v18  ;;  %v432_v18 = vand.u32 4294901760, %v2914_v25  ;;  %v478_v33 = vsub.f32 %v2653_v30, %v477_v55  ;;  %2045 = vmatpush1.bf16.msra.mxu0 %v2837_v22  ;;  %1855 = vmatprep.subr.bf16.mxu1 %v2843_v2  ;;  %v495_v22 = vand.u32 4294901760, %v2675_v45  ;;  %v507_v16 = vand.u32 4294901760, %v2677_v46 }
  0x8c   : > { %3801 = vst [vmem:[#allocation94_spill] sm:$0xff] %v2899_v29  ;;  %3802 = vst [vmem:[#allocation95_spill] sm:$0xff] %v2901_v36  ;;  %v2923_v36 = vsub.f32 %v299_v31, %v422_v5  ;;  %v2930_v29 = vsub.f32 %v234_v48, %v2905_v32  ;;  %v2936_v31 = vpack.c.bf16 %v426_v11, %v422_v5  ;;  %2047 = vmatprep.subr.bf16.mxu0 %v2843_v2 }
  0x8d   : > { %3803 = vst [vmem:[#allocation96_spill] sm:$0xff] %v2905_v32  ;;  %3804 = vst [vmem:[#allocation97_spill] sm:$0xff] %v2909_v57  ;;  %v433_v17 = vsub.f32 %v2914_v25, %v432_v18  ;;  %v2943_v48 = vsub.f32 %v301_v53, %v426_v11  ;;  %v2945_v32 = vsub.f32 %v298_v0, %v424_v3  ;;  %v467_v30 = vand.u32 4294901760, %v466_v9 }
  0x8e   : > { %3805 = vst [vmem:[#allocation98_spill] sm:$0xff] %v2914_v25  ;;  %3806 = vst [vmem:[#allocation99_spill] sm:$0xff] %v2923_v36  ;;  %v479_v26 = vand.u32 4294901760, %v478_v33  ;;  %1208 = vmatprep.mubr.f32.mxu0 %v432_v18  ;;  %v2950_v25 = vpack.c.bf16 %v428_v19, %v424_v3  ;;  %v2952_v38 = vsub.f32 %v300_v50, %v428_v19  ;;  %v473_v36 = vand.u32 4294901760, %v472_v49 }
  0x8f   : > { %3807 = vst [vmem:[#allocation100_spill] sm:$0xff] %v2930_v29  ;;  %3808 = vst [vmem:[#allocation101_spill] sm:$0xff] %v2936_v31  ;;  %v434_v5 = vand.u32 4294901760, %v433_v17  ;;  %v490_v53 = vsub.f32 %v2666_v39, %v489_v43  ;;  %1857 = vmatpush1.bf16.msra.mxu1 %v2855_v20  ;;  %2049 = vmatpush1.bf16.msra.mxu0 %v2855_v20  ;;  %v3810_v11 = vand.u32 4294901760, %v2930_v29  ;;  %v485_v9 = vand.u32 4294901760, %v484_v40 }
  0x90   : > { %3809 = vst [vmem:[#allocation102_spill] sm:$0xff] %v2950_v25  ;;  %v502_v18 = vsub.f32 %v2673_v44, %v501_v37  ;;  %v513_v3 = vand.u32 4294901760, %v2679_v47  ;;  %1859 = vmatprep.subr.bf16.mxu1 %v2863_v42  ;;  %2051 = vmatprep.subr.bf16.mxu0 %v2863_v42  ;;  %v2966_v19 = vpack.c.bf16 %v477_v55, %v465_v41  ;;  %v525_v33 = vand.u32 4294901760, %v2691_v58 }
  0x91   : > { %v2960_v0 = vsub.f32 %v2930_v29, %v3810_v11  ;;  %v496_v50 = vsub.f32 %v2675_v45, %v495_v22  ;;  %v519_v49 = vand.u32 4294901760, %v2693_v59  ;;  %435 = vmatprep.mubr.f32.mxu1 %v434_v5  ;;  %v2971_v17 = vpack.c.bf16 %v479_v26, %v467_v30 }
  0x92   : > { %v2973_v40 = vpack.c.bf16 %v483_v4, %v471_v21  ;;  %v508_v11 = vsub.f32 %v2677_v46, %v507_v16  ;;  %v531_v20 = vand.u32 4294901760, %v2695_v60  ;;  %v491_v2 = vand.u32 4294901760, %v490_v53 }
  0x93   : > { %v514_v42 = vsub.f32 %v2679_v47, %v513_v3  ;;  %v526_v41 = vsub.f32 %v2691_v58, %v525_v33  ;;  %v537_v55 = vand.u32 4294901760, %v2697_v61  ;;  %1861 = vmatpush1.bf16.msra.mxu1 %v2871_v51  ;;  %2053 = vmatpush1.bf16.msra.mxu0 %v2871_v51  ;;  %v2983_v30 = vpack.c.bf16 %v485_v9, %v473_v36 }
  0x94   : > { %v503_v4 = vand.u32 4294901760, %v502_v18  ;;  %v2985_v21 = vpack.c.bf16 %v501_v37, %v489_v43  ;;  %1863 = vmatprep.subr.bf16.mxu1 %v2877_v7  ;;  %2055 = vmatprep.subr.bf16.mxu0 %v2877_v7  ;;  %v497_v5 = vand.u32 4294901760, %v496_v50  ;;  %v520_v53 = vsub.f32 %v2693_v59, %v519_v49 }
  0x95   : > { %v532_v44 = vsub.f32 %v2695_v60, %v531_v20  ;;  %v549_v39 = vand.u32 4294901760, %v2700_v63  ;;  %v509_v58 = vand.u32 4294901760, %v508_v11  ;;  %v543_v51 = vand.u32 4294901760, %v2704_v1 }
  0x96   : > { %v555_v36 = vand.u32 4294901760, %v2711_v6  ;;  %v561_v9 = vand.u32 4294901760, %v2715_v8  ;;  %v2995_v37 = vpack.c.bf16 %v507_v16, %v495_v22  ;;  %v515_v43 = vand.u32 4294901760, %v514_v42 }
  0x97   : > { %v527_v18 = vand.u32 4294901760, %v526_v41  ;;  %v538_v26 = vsub.f32 %v2697_v61, %v537_v55  ;;  %1865 = vmatpush1.bf16.msra.mxu1 %v2888_v62  ;;  %2057 = vmatpush1.bf16.msra.mxu0 %v2888_v62  ;;  %v3000_v50 = vpack.c.bf16 %v503_v4, %v491_v2  ;;  %v3002_v7 = vpack.c.bf16 %v525_v33, %v513_v3 }
  0x98   : > { %v550_v11 = vsub.f32 %v2700_v63, %v549_v39  ;;  %v573_v60 = vand.u32 4294901760, %v2721_v12  ;;  %1867 = vmatprep.subr.bf16.mxu1 %v2895_v23  ;;  %2059 = vmatprep.subr.bf16.mxu0 %v2895_v23  ;;  %v521_v22 = vand.u32 4294901760, %v520_v53  ;;  %v533_v42 = vand.u32 4294901760, %v532_v44 }
  0x99   : > { %v544_v16 = vsub.f32 %v2704_v1, %v543_v51  ;;  %v556_v41 = vsub.f32 %v2711_v6, %v555_v36  ;;  %v3010_v61 = vpack.c.bf16 %v509_v58, %v497_v5  ;;  %v3012_v2 = vpack.c.bf16 %v531_v20, %v519_v49 }
  0x9a   : > { %v562_v3 = vsub.f32 %v2715_v8, %v561_v9  ;;  %v567_v33 = vand.u32 4294901760, %v2725_v14  ;;  %v3016_v4 = vpack.c.bf16 %v527_v18, %v515_v43  ;;  %v539_v62 = vand.u32 4294901760, %v538_v26 }
  0x9b   : > { %v574_v63 = vsub.f32 %v2721_v12, %v573_v60  ;;  %v579_v53 = vand.u32 4294901760, %v2731_v27  ;;  %1869 = vmatpush1.bf16.msra.mxu1 %v2909_v57  ;;  %2061 = vmatpush1.bf16.msra.mxu0 %v2909_v57  ;;  %v551_v44 = vand.u32 4294901760, %v550_v11  ;;  %v3022_v58 = vpack.c.bf16 %v549_v39, %v537_v55 }
  0x9c   : > { %v585_v20 = vand.u32 4294901760, %v2733_v28  ;;  %v597_v49 = vand.u32 4294901760, %v2739_v34  ;;  %1871 = vmatprep.subr.bf16.mxu1 %v2936_v31  ;;  %2063 = vmatprep.subr.bf16.mxu0 %v2936_v31  ;;  %v3028_v26 = vpack.c.bf16 %v533_v42, %v521_v22  ;;  %v545_v5 = vand.u32 4294901760, %v544_v16 }
  0x9d   : > { %v557_v43 = vand.u32 4294901760, %v556_v41  ;;  %v591_v18 = vand.u32 4294901760, %v2741_v35  ;;  %v3031_v23 = vpack.c.bf16 %v555_v36, %v543_v51  ;;  %v563_v57 = vand.u32 4294901760, %v562_v3  ;;  %v3811_v36 = vld [vmem:[#allocation46_spill] sm:$0xff] }
  0x9e   : > { %v568_v39 = vsub.f32 %v2725_v14, %v567_v33  ;;  %v580_v55 = vsub.f32 %v2731_v27, %v579_v53  ;;  %v575_v11 = vand.u32 4294901760, %v574_v63  ;;  %v586_v12 = vsub.f32 %v2733_v28, %v585_v20  ;;  %v3827_v27 = vld [vmem:[#allocation67_spill] sm:$0xff] }
  0x9f   : > { %v598_v8 = vsub.f32 %v2739_v34, %v597_v49  ;;  %v603_v31 = vand.u32 4294901760, %v2750_v54  ;;  %1873 = vmatpush1.bf16.msra.mxu1 %v2950_v25  ;;  %2065 = vmatpush1.bf16.msra.mxu0 %v2950_v25  ;;  %v1886_v22 = vpack.c.bf16 %v551_v44, %v539_v62  ;;  %v3040_v42 = vpack.c.bf16 %v573_v60, %v561_v9  ;;  %v3812_v60 = vld [vmem:[#allocation48_spill] sm:$0xff] }
  0xa0   : > { %v609_v51 = vand.u32 4294901760, %v2754_v56  ;;  %v621_v16 = vand.u32 4294901760, %v3811_v36  ;;  %1875 = vmatprep.subr.bf16.mxu1 %v2971_v17  ;;  %2067 = vmatprep.subr.bf16.mxu0 %v2966_v19  ;;  %v3046_v63 = vpack.c.bf16 %v557_v43, %v545_v5  ;;  %v592_v41 = vsub.f32 %v2741_v35, %v591_v18  ;;  %v3815_v43 = vld [vmem:[#allocation49_spill] sm:$0xff] }
  0xa1   : > { %v604_v3 = vsub.f32 %v2750_v54, %v603_v31  ;;  %v569_v34 = vand.u32 4294901760, %v568_v39  ;;  %v581_v28 = vand.u32 4294901760, %v580_v55  ;;  %v3050_v25 = vpack.c.bf16 %v579_v53, %v567_v33  ;;  %v3817_v55 = vld [vmem:[#allocation52_spill] sm:$0xff] }
  0xa2   : > { %v615_v62 = vand.u32 4294901760, %v3812_v60  ;;  %v3813_v9 = vand.u32 4294901760, %v2960_v0  ;;  %v3814_v44 = vand.u32 4294901760, %v2930_v29  ;;  %v3057_v17 = vpack.c.bf16 %v575_v11, %v563_v57 }
  0xa3   : > { %v587_v19 = vand.u32 4294901760, %v586_v12  ;;  %v599_v5 = vand.u32 4294901760, %v598_v8  ;;  %v627_v35 = vand.u32 4294901760, %v3815_v43  ;;  %v3062_v33 = vpack.c.bf16 %v597_v49, %v585_v20  ;;  %v3816_v12 = vld [vmem:[#allocation50_spill] sm:$0xff] }
  0xa4   : > { %441 = vmatmul.mubr.f32.vlgmr.msra.gmra.mrb[0].mxu1 %v3813_v9  ;;  %1212 = vmatmul.mubr.f32.vlgmr.msra.gmra.mrb[0].mxu0 %v3814_v44  ;;  %v610_v53 = vsub.f32 %v2754_v56, %v609_v51  ;;  %v622_v0 = vsub.f32 %v3811_v36, %v621_v16  ;;  %v593_v57 = vand.u32 4294901760, %v592_v41  ;;  %v605_v39 = vand.u32 4294901760, %v604_v3  ;;  %v3818_v20 = vld [vmem:[#allocation54_spill] sm:$0xff]  ;;  %v3820_v41 = vld [vmem:[#allocation57_spill] sm:$0xff] }
  0xa5   : > { %1877 = vmatpush1.bf16.msra.mxu1 %v2983_v30  ;;  %2069 = vmatpush1.bf16.msra.mxu0 %v2973_v40  ;;  %v633_v8 = vand.u32 4294901760, %v3816_v12  ;;  %v645_v11 = vand.u32 4294901760, %v3817_v55  ;;  %v3070_v9 = vpack.c.bf16 %v581_v28, %v569_v34  ;;  %v616_v40 = vsub.f32 %v3812_v60, %v615_v62  ;;  %v3821_v60 = vld [vmem:[#allocation58_spill] sm:$0xff]  ;;  %v3823_v56 = vld [vmem:[#allocation61_spill] sm:$0xff] }
  0xa6   : > { %1879 = vmatprep.subr.bf16.mxu1 %v3000_v50  ;;  %2071 = vmatprep.subr.bf16.mxu0 %v2985_v21  ;;  %v628_v30 = vsub.f32 %v3815_v43, %v627_v35  ;;  %v639_v49 = vand.u32 4294901760, %v3818_v20  ;;  %v3075_v44 = vpack.c.bf16 %v599_v5, %v587_v19  ;;  %v3077_v29 = vpack.c.bf16 %v603_v31, %v591_v18  ;;  %v3819_v50 = vld [vmem:[#allocation55_spill] sm:$0xff] }
  0xa7   : > { %v651_v21 = vand.u32 4294901760, %v3819_v50  ;;  %v657_v3 = vand.u32 4294901760, %v3820_v41  ;;  %v611_v28 = vand.u32 4294901760, %v610_v53  ;;  %v623_v34 = vand.u32 4294901760, %v622_v0  ;;  %v3822_v53 = vld [vmem:[#allocation59_spill] sm:$0xff] }
  0xa8   : > { %v3083_v36 = vpack.c.bf16 %v621_v16, %v609_v51  ;;  %v669_v43 = vand.u32 4294901760, %v3821_v60  ;;  %v3088_v31 = vpack.c.bf16 %v605_v39, %v593_v57  ;;  %v634_v18 = vsub.f32 %v3816_v12, %v633_v8 }
  0xa9   : > { %1881 = vmatpush1.bf16.msra.mxu1 %v3010_v61  ;;  %2073 = vmatpush1.bf16.msra.mxu0 %v2995_v37  ;;  %v646_v19 = vsub.f32 %v3817_v55, %v645_v11  ;;  %v617_v5 = vand.u32 4294901760, %v616_v40  ;;  %v629_v61 = vand.u32 4294901760, %v628_v30  ;;  %v640_v37 = vsub.f32 %v3818_v20, %v639_v49  ;;  %v3824_v40 = vld [vmem:[#allocation63_spill] sm:$0xff]  ;;  %v3825_v20 = vld [vmem:[#allocation64_spill] sm:$0xff] }
  0xaa   : > { %1883 = vmatprep.subr.bf16.mxu1 %v3016_v4  ;;  %2075 = vmatprep.subr.bf16.mxu0 %v3002_v7  ;;  %v663_v0 = vand.u32 4294901760, %v3822_v53  ;;  %v3094_v51 = vpack.c.bf16 %v627_v35, %v615_v62  ;;  %v652_v16 = vsub.f32 %v3819_v50, %v651_v21  ;;  %v658_v4 = vsub.f32 %v3820_v41, %v657_v3  ;;  %v3826_v50 = vld [vmem:[#allocation66_spill] sm:$0xff] }
  0xab   : > { %v675_v7 = vand.u32 4294901760, %v3823_v56  ;;  %v3101_v57 = vpack.c.bf16 %v623_v34, %v611_v28  ;;  %v670_v39 = vsub.f32 %v3821_v60, %v669_v43  ;;  %v681_v30 = vand.u32 4294901760, %v3824_v40 }
  0xac   : > { %v693_v55 = vand.u32 4294901760, %v3825_v20  ;;  %v635_v35 = vand.u32 4294901760, %v634_v18  ;;  %v647_v62 = vand.u32 4294901760, %v646_v19  ;;  %v3107_v41 = vpack.c.bf16 %v645_v11, %v633_v8  ;;  %v3829_v18 = vld [vmem:[#allocation70_spill] sm:$0xff] }
  0xad   : > { %1885 = vmatpush1.bf16.msra.mxu1 %v3028_v26  ;;  %2077 = vmatpush1.bf16.msra.mxu0 %v3012_v2  ;;  %v687_v12 = vand.u32 4294901760, %v3826_v50  ;;  %v3110_v26 = vpack.c.bf16 %v629_v61, %v617_v5  ;;  %v641_v2 = vand.u32 4294901760, %v640_v37  ;;  %v664_v28 = vsub.f32 %v3822_v53, %v663_v0  ;;  %v3831_v53 = vld [vmem:[#allocation73_spill] sm:$0xff] }
  0xae   : > { %1887 = vmatprep.subr.bf16.mxu1 %v1886_v22  ;;  %2079 = vmatprep.subr.bf16.mxu0 %v3022_v58  ;;  %v676_v34 = vsub.f32 %v3823_v56, %v675_v7  ;;  %v653_v60 = vand.u32 4294901760, %v652_v16  ;;  %v659_v54 = vand.u32 4294901760, %v658_v4  ;;  %v699_v14 = vand.u32 4294901760, %v3827_v27  ;;  %v3828_v22 = vld [vmem:[#allocation69_spill] sm:$0xff] }
  0xaf   : > { %v705_v6 = vand.u32 4294901760, %v3828_v22  ;;  %v671_v58 = vand.u32 4294901760, %v670_v39  ;;  %v682_v8 = vsub.f32 %v3824_v40, %v681_v30  ;;  %v694_v11 = vsub.f32 %v3825_v20, %v693_v55 }
  0xb0   : > { %v717_v19 = vand.u32 4294901760, %v3829_v18  ;;  %v3123_v5 = vpack.c.bf16 %v651_v21, %v639_v49  ;;  %v688_v61 = vsub.f32 %v3826_v50, %v687_v12  ;;  %v700_v37 = vsub.f32 %v3827_v27, %v699_v14 }
  0xb1   : > { %1889 = vmatpush1.bf16.msra.mxu1 %v3046_v63  ;;  %2081 = vmatpush1.bf16.msra.mxu0 %v3031_v23  ;;  %v3830_v63 = vld [vmem:[#allocation72_spill] sm:$0xff]  ;;  %v1902_v23 = vpack.c.bf16 %v647_v62, %v635_v35  ;;  %v3128_v4 = vpack.c.bf16 %v669_v43, %v657_v3  ;;  %v665_v39 = vand.u32 4294901760, %v664_v28  ;;  %v677_v40 = vand.u32 4294901760, %v676_v34 }
  0xb2   : > { %1891 = vmatprep.subr.bf16.mxu1 %v3057_v17  ;;  %2083 = vmatprep.subr.bf16.mxu0 %v3040_v42  ;;  %v711_v16 = vand.u32 4294901760, %v3830_v63  ;;  %v1904_v20 = vpack.c.bf16 %v653_v60, %v641_v2  ;;  %v706_v56 = vsub.f32 %v3828_v22, %v705_v6  ;;  %v718_v17 = vsub.f32 %v3829_v18, %v717_v19  ;;  %v3883_v22 = vld [vmem:[#allocation85_spill] sm:$0xff] }
  0xb3   : > { %v723_v42 = vand.u32 4294901760, %v3831_v53  ;;  %v3135_v49 = vpack.c.bf16 %v671_v58, %v659_v54  ;;  %v3137_v21 = vpack.c.bf16 %v675_v7, %v663_v0  ;;  %v683_v35 = vand.u32 4294901760, %v682_v8  ;;  %v3832_v54 = vld [vmem:[#allocation75_spill] sm:$0xff]  ;;  %v3833_v0 = vld [vmem:[#allocation76_spill] sm:$0xff]  ;;  %v3834_v8 = vld [vmem:[#allocation78_spill] sm:$0xff] }
  0xb4   : > { %v695_v43 = vand.u32 4294901760, %v694_v11  ;;  %v3141_v60 = vpack.c.bf16 %v693_v55, %v681_v30  ;;  %v689_v3 = vand.u32 4294901760, %v688_v61  ;;  %v701_v62 = vand.u32 4294901760, %v700_v37  ;;  %v3835_v11 = vld [vmem:[#allocation82_spill] sm:$0xff] }
  0xb5   : > { %1893 = vmatpush1.bf16.msra.mxu1 %v3070_v9  ;;  %2085 = vmatpush1.bf16.msra.mxu0 %v3050_v25  ;;  %v712_v2 = vsub.f32 %v3830_v63, %v711_v16  ;;  %v3144_v28 = vpack.c.bf16 %v677_v40, %v665_v39  ;;  %v724_v25 = vsub.f32 %v3831_v53, %v723_v42  ;;  %v729_v9 = vand.u32 4294901760, %v3832_v54  ;;  %v3842_v53 = vld [vmem:[#allocation95_spill] sm:$0xff] }
  0xb6   : > { %1895 = vmatprep.subr.bf16.mxu1 %v3075_v44  ;;  %2087 = vmatprep.subr.bf16.mxu0 %v3062_v33  ;;  %v741_v7 = vand.u32 4294901760, %v3833_v0  ;;  %v707_v34 = vand.u32 4294901760, %v706_v56  ;;  %v719_v58 = vand.u32 4294901760, %v718_v17  ;;  %v735_v44 = vand.u32 4294901760, %v3834_v8 }
  0xb7   : > { %v747_v33 = vand.u32 4294901760, %v2861_v13  ;;  %v3153_v55 = vpack.c.bf16 %v695_v43, %v683_v35  ;;  %v3155_v40 = vpack.c.bf16 %v699_v14, %v687_v12  ;;  %v753_v30 = vand.u32 4294901760, %v2867_v10  ;;  %v3836_v43 = vld [vmem:[#allocation85_spill] sm:$0xff] }
  0xb8   : > { %v765_v61 = vand.u32 4294901760, %v3835_v11  ;;  %v3161_v56 = vpack.c.bf16 %v701_v62, %v689_v3  ;;  %v3163_v37 = vpack.c.bf16 %v717_v19, %v705_v6  ;;  %v713_v39 = vand.u32 4294901760, %v712_v2  ;;  %v3837_v2 = vld [vmem:[#allocation87_spill] sm:$0xff] }
  0xb9   : > { %1897 = vmatpush1.bf16.msra.mxu1 %v3088_v31  ;;  %2089 = vmatpush1.bf16.msra.mxu0 %v3077_v29  ;;  %v759_v31 = vand.u32 4294901760, %v2873_v15  ;;  %v725_v29 = vand.u32 4294901760, %v724_v25  ;;  %v3166_v17 = vpack.c.bf16 %v723_v42, %v711_v16  ;;  %v730_v14 = vsub.f32 %v3832_v54, %v729_v9 }
  0xba   : > { %1899 = vmatprep.subr.bf16.mxu1 %v3101_v57  ;;  %2091 = vmatprep.subr.bf16.mxu0 %v3083_v36  ;;  %v742_v12 = vsub.f32 %v3833_v0, %v741_v7  ;;  %v3170_v35 = vpack.c.bf16 %v719_v58, %v707_v34  ;;  %v736_v57 = vsub.f32 %v3834_v8, %v735_v44  ;;  %v771_v3 = vand.u32 4294901760, %v3836_v43  ;;  %v3838_v34 = vld [vmem:[#allocation88_spill] sm:$0xff]  ;;  %v3841_v0 = vld [vmem:[#allocation93_spill] sm:$0xff] }
  0xbb   : > { %v748_v36 = vsub.f32 %v2861_v13, %v747_v33  ;;  %v3177_v6 = vpack.c.bf16 %v741_v7, %v729_v9  ;;  %v754_v19 = vsub.f32 %v2867_v10, %v753_v30  ;;  %v766_v16 = vsub.f32 %v3835_v11, %v765_v61  ;;  %v3839_v7 = vld [vmem:[#allocation90_spill] sm:$0xff]  ;;  %v3840_v11 = vld [vmem:[#allocation91_spill] sm:$0xff] }
  0xbc   : > { %v760_v42 = vsub.f32 %v2873_v15, %v759_v31  ;;  %v772_v62 = vsub.f32 %v3836_v43, %v771_v3  ;;  %v777_v25 = vand.u32 4294901760, %v3837_v2  ;;  %v789_v58 = vand.u32 4294901760, %v3838_v34 }
  0xbd   : > { %1901 = vmatpush1.bf16.msra.mxu1 %v3110_v26  ;;  %2093 = vmatpush1.bf16.msra.mxu0 %v3094_v51  ;;  %v3186_v26 = vpack.c.bf16 %v725_v29, %v713_v39  ;;  %v731_v51 = vand.u32 4294901760, %v730_v14  ;;  %v743_v9 = vand.u32 4294901760, %v742_v12  ;;  %v783_v13 = vand.u32 4294901760, %v3839_v7  ;;  %v237_v29 = vld [vmem:[#allocation3 + $0x18] sm:$0xff] }
  0xbe   : > { %1903 = vmatprep.subr.bf16.mxu1 %v1902_v23  ;;  %2095 = vmatprep.subr.bf16.mxu0 %v3107_v41  ;;  %v737_v10 = vand.u32 4294901760, %v736_v57  ;;  %v749_v8 = vand.u32 4294901760, %v748_v36  ;;  %v795_v23 = vand.u32 4294901760, %v3840_v11  ;;  %v801_v41 = vand.u32 4294901760, %v3841_v0 }
  0xbf   : > { %v3192_v43 = vpack.c.bf16 %v747_v33, %v735_v44  ;;  %v755_v15 = vand.u32 4294901760, %v754_v19  ;;  %v767_v54 = vand.u32 4294901760, %v766_v16  ;;  %v813_v39 = vand.u32 4294901760, %v3842_v53 }
  0xc0   : > { %v761_v14 = vand.u32 4294901760, %v760_v42  ;;  %v773_v12 = vand.u32 4294901760, %v772_v62  ;;  %v778_v57 = vsub.f32 %v3837_v2, %v777_v25  ;;  %v790_v36 = vsub.f32 %v3838_v34, %v789_v58  ;;  %v236_v42 = vld [vmem:[#allocation3 + $0x10] sm:$0xff] }
  0xc1   : > { %1905 = vmatpush1.bf16.msra.mxu1 %v1904_v20  ;;  %2097 = vmatpush1.bf16.msra.mxu0 %v3123_v5  ;;  %v1918_v20 = vpack.c.bf16 %v743_v9, %v731_v51  ;;  %v3199_v63 = vpack.c.bf16 %v765_v61, %v753_v30  ;;  %v784_v5 = vsub.f32 %v3839_v7, %v783_v13  ;;  %v3700_v51 = vand.u32 4294901760, %v2919_v24 }
  0xc2   : > { %1907 = vmatprep.subr.bf16.mxu1 %v3135_v49  ;;  %2099 = vmatprep.subr.bf16.mxu0 %v3128_v4  ;;  %v796_v44 = vsub.f32 %v3840_v11, %v795_v23  ;;  %v3203_v33 = vpack.c.bf16 %v749_v8, %v737_v10  ;;  %v802_v19 = vsub.f32 %v3841_v0, %v801_v41  ;;  %v3207_v4 = vand.u32 4294901760, %v237_v29 }
  0xc3   : > { %v814_v49 = vsub.f32 %v3842_v53, %v813_v39  ;;  %v3211_v16 = vpack.c.bf16 %v767_v54, %v755_v15  ;;  %v3213_v30 = vpack.c.bf16 %v771_v3, %v759_v31  ;;  %v3215_v61 = vpack.c.bf16 %v789_v58, %v777_v25  ;;  %v3844_v3 = vld [vmem:[#allocation99_spill] sm:$0xff] }
  0xc4   : > { %v3219_v10 = vpack.c.bf16 %v773_v12, %v761_v14  ;;  %v779_v8 = vand.u32 4294901760, %v778_v57  ;;  %v791_v62 = vand.u32 4294901760, %v790_v36  ;;  %v797_v9 = vand.u32 4294901760, %v796_v44 }
  0xc5   : > { %1909 = vmatpush1.bf16.msra.mxu1 %v3144_v28  ;;  %2101 = vmatpush1.bf16.msra.mxu0 %v3137_v21  ;;  %v785_v28 = vand.u32 4294901760, %v784_v5  ;;  %v3699_v15 = vand.u32 4294901760, %v2921_v52  ;;  %v3224_v21 = vsub.f32 %v237_v29, %v3207_v4  ;;  %v803_v54 = vand.u32 4294901760, %v802_v19 }
  0xc6   : > { %1911 = vmatprep.subr.bf16.mxu1 %v3153_v55  ;;  %2103 = vmatprep.subr.bf16.mxu0 %v3141_v60  ;;  %v815_v31 = vand.u32 4294901760, %v814_v49  ;;  %v3698_v25 = vand.u32 4294901760, %v3844_v3  ;;  %v3227_v55 = vand.u32 4294901760, %v236_v42  ;;  %v3231_v60 = vpack.c.bf16 %v795_v23, %v783_v13  ;;  %v3873_v49 = vld [vmem:[#allocation64_spill] sm:$0xff] }
  0xc7   : > { %3843 = vst [vmem:[#allocation66_spill] sm:$0xff] %v3224_v21  ;;  %v448_v58 = vand.u32 4294901760, %v3224_v21  ;;  %v3697_v14 = vand.u32 4294901760, %v2943_v48  ;;  %v3696_v12 = vand.u32 4294901760, %v2945_v32  ;;  %v1926_v29 = vpack.c.bf16 %v791_v62, %v779_v8  ;;  %v3847_v8 = vld [vmem:[#allocation26_spill] sm:$0xff]  ;;  %v3879_v62 = vld [vmem:[#allocation79_spill] sm:$0xff] }
  0xc8   : > { %v3238_v57 = vpack.c.bf16 %v813_v39, %v801_v41  ;;  %v3241_v36 = vsub.f32 %v236_v42, %v3227_v55  ;;  %v3248_v13 = vsub.f32 %v2919_v24, %v3700_v51  ;;  %v3252_v23 = vpack.c.bf16 %v815_v31, %v803_v54  ;;  %v3849_v54 = vld [vmem:[#allocation28_spill] sm:$0xff]  ;;  %v3853_v42 = vld [vmem:[#allocation34_spill] sm:$0xff]  ;;  %v3880_v31 = vld [vmem:[#allocation81_spill] sm:$0xff] }
  0xc9   : > { %1913 = vmatpush1.bf16.msra.mxu1 %v3161_v56  ;;  %2105 = vmatpush1.bf16.msra.mxu0 %v3155_v40  ;;  %v3243_v56 = vpack.c.bf16 %v797_v9, %v785_v28  ;;  %v449_v40 = vsub.f32 %v3224_v21, %v448_v58  ;;  %v3260_v41 = vsub.f32 %v3844_v3, %v3698_v25  ;;  %v3848_v9 = vld [vmem:[#allocation27_spill] sm:$0xff]  ;;  %v3881_v21 = vld [vmem:[#allocation82_spill] sm:$0xff]  ;;  %v3886_v18 = vand.u32 4294901760, %v3844_v3 }
  0xca   : > { %1915 = vmatprep.subr.bf16.mxu1 %v3170_v35  ;;  %2107 = vmatprep.subr.bf16.mxu0 %v3163_v37  ;;  %3845 = vst [vmem:[#allocation67_spill] sm:$0xff] %v3241_v36  ;;  %v3701_v35 = vand.u32 4294901760, %v2952_v38  ;;  %v820_v37 = vsub.f32 %v2921_v52, %v3699_v15  ;;  %v454_v39 = vand.u32 4294901760, %v3241_v36  ;;  %v838_v44 = vsub.f32 %v2943_v48, %v3697_v14  ;;  %v3867_v15 = vld [vmem:[#allocation55_spill] sm:$0xff]  ;;  %v3878_v14 = vld [vmem:[#allocation78_spill] sm:$0xff] }
  0xcb   : > { %1220 = vmatprep.mubr.f32.mxu0 %v448_v58  ;;  %v450_v5 = vand.u32 4294901760, %v449_v40  ;;  %v3271_v19 = vsub.f32 %v2945_v32, %v3696_v12  ;;  %v3851_v40 = vld [vmem:[#allocation94_spill] sm:$0xff]  ;;  %v3863_v12 = vld [vmem:[#allocation49_spill] sm:$0xff]  ;;  %v1986_v1 = vpack.c.bf16 %v3881_v21, %v3880_v31  ;;  %v3969_v31 = vpack.c.bf16 %v2921_v52, %v2919_v24 }
  0xcc   : > { %v844_v28 = vsub.f32 %v2952_v38, %v3701_v35  ;;  %1224 = vmatmul.mubr.f32.gmra.mrb[2].mxu0 %v454_v39  ;;  %v821_v51 = vand.u32 4294901760, %v820_v37  ;;  %v3874_v37 = vld [vmem:[#allocation72_spill] sm:$0xff]  ;;  %v839_v35 = vand.u32 4294901760, %v838_v44  ;;  %v3885_v44 = vand.u32 4294901760, %v2921_v52  ;;  %v3966_v21 = vld [vmem:[#allocation89_spill] sm:$0xff] }
  0xcd   : > { %1917 = vmatpush1.bf16.msra.mxu1 %v3186_v26  ;;  %2109 = vmatpush1.bf16.msra.mxu0 %v3166_v17  ;;  %v455_v26 = vsub.f32 %v3241_v36, %v454_v39  ;;  %v3846_v17 = vld [vmem:[#allocation25_spill] sm:$0xff]  ;;  %v809_v39 = vand.u32 4294901760, %v3248_v13  ;;  %v3872_v36 = vld [vmem:[#allocation63_spill] sm:$0xff] }
  0xce   : > { %1919 = vmatprep.subr.bf16.mxu1 %v1918_v20  ;;  %2111 = vmatprep.subr.bf16.mxu0 %v3177_v6  ;;  %v3850_v20 = vld [vmem:[#allocation31_spill] sm:$0xff]  ;;  %v3875_v13 = vld [vmem:[#allocation73_spill] sm:$0xff]  ;;  %v845_v25 = vand.u32 4294901760, %v844_v28 }
  0xcf   : > { %451 = vmatprep.mubr.f32.mxu1 %v450_v5  ;;  %v456_v58 = vand.u32 4294901760, %v455_v26  ;;  %1487 = vmatprep.mubr.f32.mxu0 %v3851_v40  ;;  %v3859_v6 = vld [vmem:[#allocation43_spill] sm:$0xff]  ;;  %v3864_v5 = vld [vmem:[#allocation50_spill] sm:$0xff]  ;;  %v3877_v26 = vld [vmem:[#allocation76_spill] sm:$0xff] }
  0xd1   : > { %1921 = vmatpush1.bf16.msra.mxu1 %v3203_v33  ;;  %2113 = vmatpush1.bf16.msra.mxu0 %v3192_v43  ;;  %v3865_v33 = vld [vmem:[#allocation52_spill] sm:$0xff]  ;;  %v3876_v43 = vld [vmem:[#allocation75_spill] sm:$0xff] }
  0xd2   : > { %1923 = vmatprep.subr.bf16.mxu1 %v3211_v16  ;;  %2115 = vmatprep.subr.bf16.mxu0 %v3199_v63  ;;  %v827_v16 = vand.u32 4294901760, %v3260_v41  ;;  %v3882_v63 = vld [vmem:[#allocation84_spill] sm:$0xff]  ;;  %v3977_v52 = vld [vmem:[#allocation67_spill] sm:$0xff] }
  0xd3   : > { %457 = vmatmul.mubr.f32.gmra.mrb[2].mxu1 %v456_v58 }
  0xd4   : > { %848 = vmatprep.mubr.f32.mxu1 %v3851_v40  ;;  %v1934_v41 = vpack.c.bf16 %v839_v35, %v827_v16  ;;  %v3893_v35 = vld [vmem:[#allocation19_spill] sm:$0xff] }
  0xd5   : > { %1925 = vmatpush1.bf16.msra.mxu1 %v3219_v10  ;;  %2117 = vmatpush1.bf16.msra.mxu0 %v3213_v30  ;;  %v833_v10 = vand.u32 4294901760, %v3271_v19  ;;  %v3890_v19 = vld [vmem:[#allocation15_spill] sm:$0xff] }
  0xd6   : > { %1927 = vmatprep.subr.bf16.mxu1 %v1926_v29  ;;  %2119 = vmatprep.subr.bf16.mxu0 %v3215_v61  ;;  %v1932_v29 = vpack.c.bf16 %v821_v51, %v809_v39  ;;  %v3884_v61 = vand.u32 4294901760, %v2919_v24  ;;  %v3889_v39 = vand.u32 4294901760, %v2952_v38  ;;  %v3976_v24 = vld [vmem:[#allocation66_spill] sm:$0xff] }
  0xd7   : > { %v1936_v51 = vpack.c.bf16 %v845_v25, %v833_v10  ;;  %v3896_v25 = vld [vmem:[#allocation22_spill] sm:$0xff] }
  0xd8   : > { %v2124_v58 = vpack.c.bf16 %v3885_v44, %v3884_v61  ;;  %v3900_v44 = vpack.c.bf16 %v2677_v46, %v2675_v45  ;;  %v3907_v45 = vpack.c.bf16 %v3849_v54, %v3848_v9  ;;  %v3908_v46 = vld [vmem:[#allocation24_spill] sm:$0xff]  ;;  %v3918_v9 = vld [vmem:[#allocation35_spill] sm:$0xff] }
  0xd9   : > { %1929 = vmatpush1.bf16.msra.mxu1 %v3243_v56  ;;  %2121 = vmatpush1.bf16.msra.mxu0 %v3231_v60  ;;  %v3887_v56 = vand.u32 4294901760, %v2943_v48  ;;  %v3888_v60 = vand.u32 4294901760, %v2945_v32  ;;  %v3919_v54 = vld [vmem:[#allocation40_spill] sm:$0xff] }
  0xda   : > { %1931 = vmatprep.subr.bf16.mxu1 %v3252_v23  ;;  %2123 = vmatprep.subr.bf16.mxu0 %v3238_v57  ;;  %v3891_v23 = vld [vmem:[#allocation16_spill] sm:$0xff]  ;;  %v3892_v57 = vld [vmem:[#allocation18_spill] sm:$0xff] }
  0xdb   : > { %v2126_v30 = vpack.c.bf16 %v3887_v56, %v3886_v18  ;;  %v2128_v61 = vpack.c.bf16 %v3889_v39, %v3888_v60  ;;  %v1938_v28 = vpack.c.bf16 %v3891_v23, %v3890_v19  ;;  %v1940_v16 = vpack.c.bf16 %v3893_v35, %v3892_v57  ;;  %v3894_v18 = vld [vmem:[#allocation12_spill] sm:$0xff]  ;;  %v3901_v56 = vld [vmem:[#allocation17_spill] sm:$0xff]  ;;  %v3904_v39 = vld [vmem:[#allocation98_spill] sm:$0xff] }
  0xdc   : > { %v3903_v60 = vld [vmem:[#allocation21_spill] sm:$0xff]  ;;  %v3906_v19 = vld [vmem:[#allocation23_spill] sm:$0xff]  ;;  %v3916_v57 = vld [vmem:[#allocation36_spill] sm:$0xff] }
  0xdd   : > { %1933 = vmatpush1.bf16.msra.mxu1 %v1932_v29  ;;  %2125 = vmatpush1.bf16.msra.mxu0 %v2124_v58  ;;  %v3895_v58 = vld [vmem:[#allocation20_spill] sm:$0xff]  ;;  %v3911_v23 = vld [vmem:[#allocation29_spill] sm:$0xff] }
  0xde   : > { %1935 = vmatprep.subr.bf16.mxu1 %v1934_v41  ;;  %2127 = vmatprep.subr.bf16.mxu0 %v2126_v30  ;;  %v1942_v10 = vpack.c.bf16 %v3896_v25, %v3895_v58  ;;  %v3897_v29 = vld [vmem:[#allocation96_spill] sm:$0xff]  ;;  %v3898_v30 = vld [vmem:[#allocation13_spill] sm:$0xff]  ;;  %v3899_v41 = vld [vmem:[#allocation14_spill] sm:$0xff] }
  0xdf   : > { %v3923_v58 = vld [vmem:[#allocation41_spill] sm:$0xff] }
  0xe0   : > { %v3924_v25 = vpack.c.bf16 %v3859_v6, %v3923_v58  ;;  %v3934_v6 = vld [vmem:[#allocation51_spill] sm:$0xff] }
  0xe1   : > { %1937 = vmatpush1.bf16.msra.mxu1 %v1936_v51  ;;  %2129 = vmatpush1.bf16.msra.mxu0 %v2128_v61  ;;  %v3902_v51 = vpack.c.bf16 %v3846_v17, %v2679_v47  ;;  %v3905_v61 = vpack.c.bf16 %v3847_v8, %v2693_v59  ;;  %v3909_v47 = vld [vmem:[#allocation30_spill] sm:$0xff]  ;;  %v3914_v59 = vld [vmem:[#allocation32_spill] sm:$0xff]  ;;  %v3915_v8 = vld [vmem:[#allocation37_spill] sm:$0xff] }
  0xe2   : > { %1939 = vmatprep.subr.bf16.mxu1 %v1938_v28  ;;  %2131 = vmatprep.subr.bf16.mxu0 %v3894_v18  ;;  %v3910_v17 = vpack.c.bf16 %v3850_v20, %v3909_v47  ;;  %v3917_v35 = vpack.c.bf16 %v3915_v8, %v3916_v57  ;;  %v3922_v20 = vld [vmem:[#allocation39_spill] sm:$0xff]  ;;  %v3939_v47 = vld [vmem:[#allocation57_spill] sm:$0xff]  ;;  %v3950_v57 = vld [vmem:[#allocation70_spill] sm:$0xff] }
  0xe3   : > { %v3949_v8 = vld [vmem:[#allocation65_spill] sm:$0xff] }
  0xe4   : > { %850 = vmatmul.mubr.f32.vlgmr.msra.gmra.mrb[0].mxu1 %v3897_v29  ;;  %1489 = vmatmul.mubr.f32.vlgmr.msra.gmra.mrb[0].mxu0 %v3897_v29 }
  0xe5   : > { %1941 = vmatpush1.bf16.msra.mxu1 %v1940_v16  ;;  %2133 = vmatpush1.bf16.msra.mxu0 %v3898_v30  ;;  %v3920_v16 = vld [vmem:[#allocation38_spill] sm:$0xff]  ;;  %v3927_v30 = vld [vmem:[#allocation45_spill] sm:$0xff] }
  0xe6   : > { %1943 = vmatprep.subr.bf16.mxu1 %v1942_v10  ;;  %2135 = vmatprep.subr.bf16.mxu0 %v3899_v41  ;;  %v3921_v18 = vpack.c.bf16 %v3919_v54, %v3920_v16  ;;  %v3926_v10 = vld [vmem:[#allocation46_spill] sm:$0xff]  ;;  %v3953_v54 = vld [vmem:[#allocation68_spill] sm:$0xff]  ;;  %v3954_v16 = vpack.c.bf16 %v3875_v13, %v3874_v37  ;;  %v3961_v37 = vpack.c.bf16 %v3883_v22, %v3882_v63 }
  0xe7   : > { %856 = vmatprep.mubr.f32.mxu1 %v3207_v4  ;;  %1495 = vmatprep.mubr.f32.mxu0 %v3207_v4  ;;  %v3928_v41 = vpack.c.bf16 %v3926_v10, %v3927_v30  ;;  %v3960_v13 = vld [vmem:[#allocation80_spill] sm:$0xff] }
  0xe8   : > { %858 = vmatmul.mubr.f32.gmra.mrb[2].mxu1 %v3227_v55  ;;  %1497 = vmatmul.mubr.f32.gmra.mrb[2].mxu0 %v3227_v55  ;;  %v3968_v22 = vld [vmem:[#allocation92_spill] sm:$0xff] }
  0xe9   : > { %1945 = vmatpush1.bf16.msra.mxu1 %v3900_v44  ;;  %2137 = vmatpush1.bf16.msra.mxu0 %v3901_v56  ;;  %v3929_v44 = vld [vmem:[#allocation44_spill] sm:$0xff] }
  0xea   : > { %1947 = vmatprep.subr.bf16.mxu1 %v3902_v51  ;;  %2139 = vmatprep.subr.bf16.mxu0 %v3903_v60  ;;  %v3930_v56 = vld [vmem:[#allocation48_spill] sm:$0xff]  ;;  %v3932_v60 = vld [vmem:[#allocation47_spill] sm:$0xff] }
  0xeb   : > { %1058 = vmatprep.mubr.f32.mxu1 %v3904_v39  ;;  %1632 = vmatprep.mubr.f32.mxu0 %v3851_v40  ;;  %v3912_v40 = vld [vmem:[#allocation33_spill] sm:$0xff]  ;;  %v3931_v51 = vpack.c.bf16 %v3863_v12, %v3930_v56  ;;  %v3933_v39 = vpack.c.bf16 %v3865_v33, %v3864_v5  ;;  %v3941_v12 = vld [vmem:[#allocation56_spill] sm:$0xff]  ;;  %v3946_v33 = vpack.c.bf16 %v3873_v49, %v3872_v36  ;;  %v3955_v36 = vld [vmem:[#allocation71_spill] sm:$0xff] }
  0xec   : > { %v3913_v28 = vpack.c.bf16 %v3853_v42, %v3912_v40  ;;  %v3925_v42 = vld [vmem:[#allocation42_spill] sm:$0xff]  ;;  %v3943_v40 = vld [vmem:[#allocation59_spill] sm:$0xff]  ;;  %v3945_v5 = vld [vmem:[#allocation60_spill] sm:$0xff]  ;;  %v3956_v49 = vpack.c.bf16 %v3877_v26, %v3876_v43  ;;  %v3963_v43 = vpack.c.bf16 %v3838_v34, %v3837_v2  ;;  %v3971_v34 = vpack.c.bf16 %v2943_v48, %v3844_v3 }
  0xed   : > { %1949 = vmatpush1.bf16.msra.mxu1 %v3905_v61  ;;  %2141 = vmatpush1.bf16.msra.mxu0 %v3906_v19  ;;  %v3935_v61 = vld [vmem:[#allocation54_spill] sm:$0xff]  ;;  %v3962_v26 = vld [vmem:[#allocation83_spill] sm:$0xff]  ;;  %v3970_v2 = vld [vmem:[#allocation97_spill] sm:$0xff] }
  0xee   : > { %1951 = vmatprep.subr.bf16.mxu1 %v3907_v45  ;;  %2143 = vmatprep.subr.bf16.mxu0 %v3908_v46  ;;  %v3936_v19 = vpack.c.bf16 %v3867_v15, %v3935_v61  ;;  %v3937_v45 = vld [vmem:[#allocation53_spill] sm:$0xff]  ;;  %v3938_v46 = vld [vmem:[#allocation58_spill] sm:$0xff] }
  0xef   : > { %v3947_v15 = vld [vmem:[#allocation62_spill] sm:$0xff] }
  0xf1   : > { %1953 = vmatpush1.bf16.msra.mxu1 %v3910_v17  ;;  %2145 = vmatpush1.bf16.msra.mxu0 %v3911_v23  ;;  %v3940_v17 = vpack.c.bf16 %v3938_v46, %v3939_v47  ;;  %v3942_v23 = vld [vmem:[#allocation61_spill] sm:$0xff] }
  0xf2   : > { %1955 = vmatprep.subr.bf16.mxu1 %v3913_v28  ;;  %2147 = vmatprep.subr.bf16.mxu0 %v3914_v59  ;;  %v3944_v28 = vpack.c.bf16 %v3942_v23, %v3943_v40  ;;  %v3948_v59 = vpack.c.bf16 %v3827_v27, %v3826_v50  ;;  %v3957_v27 = vld [vmem:[#allocation74_spill] sm:$0xff]  ;;  %v3958_v50 = vpack.c.bf16 %v3879_v62, %v3878_v14 }
  0xf3   : > { %v3964_v14 = vld [vmem:[#allocation86_spill] sm:$0xff]  ;;  %v3965_v62 = vpack.c.bf16 %v3840_v11, %v3839_v7  ;;  %v3972_v11 = vld [vmem:[#allocation101_spill] sm:$0xff]  ;;  %v3973_v7 = vpack.c.bf16 %v2952_v38, %v2945_v32 }
  0xf5   : > { %1957 = vmatpush1.bf16.msra.mxu1 %v3917_v35  ;;  %2149 = vmatpush1.bf16.msra.mxu0 %v3918_v9  ;;  %v3951_v35 = vld [vmem:[#allocation69_spill] sm:$0xff] }
  0xf6   : > { %1959 = vmatprep.subr.bf16.mxu1 %v3921_v18  ;;  %2151 = vmatprep.subr.bf16.mxu0 %v3922_v20  ;;  %v3952_v9 = vpack.c.bf16 %v3950_v57, %v3951_v35  ;;  %v3959_v18 = vld [vmem:[#allocation77_spill] sm:$0xff] }
  0xf9   : > { %1961 = vmatpush1.bf16.msra.mxu1 %v3924_v25  ;;  %2153 = vmatpush1.bf16.msra.mxu0 %v3925_v42 }
  0xfa   : > { %1963 = vmatprep.subr.bf16.mxu1 %v3928_v41  ;;  %2155 = vmatprep.subr.bf16.mxu0 %v3929_v44 }
  0xfd   : > { %1965 = vmatpush1.bf16.msra.mxu1 %v3931_v51  ;;  %2157 = vmatpush1.bf16.msra.mxu0 %v3932_v60 }
  0xfe   : > { %1967 = vmatprep.subr.bf16.mxu1 %v3933_v39  ;;  %2159 = vmatprep.subr.bf16.mxu0 %v3934_v6 }
 0x101   : > { %1969 = vmatpush1.bf16.msra.mxu1 %v3936_v19  ;;  %2161 = vmatpush1.bf16.msra.mxu0 %v3937_v45 }
 0x102   : > { %1971 = vmatprep.subr.bf16.mxu1 %v3940_v17  ;;  %2163 = vmatprep.subr.bf16.mxu0 %v3941_v12 }
 0x105   : > { %1973 = vmatpush1.bf16.msra.mxu1 %v3944_v28  ;;  %2165 = vmatpush1.bf16.msra.mxu0 %v3945_v5 }
 0x106   : > { %1975 = vmatprep.subr.bf16.mxu1 %v3946_v33  ;;  %2167 = vmatprep.subr.bf16.mxu0 %v3947_v15 }
 0x109   : > { %1977 = vmatpush1.bf16.msra.mxu1 %v3948_v59  ;;  %2169 = vmatpush1.bf16.msra.mxu0 %v3949_v8 }
 0x10a   : > { %1979 = vmatprep.subr.bf16.mxu1 %v3952_v9  ;;  %2171 = vmatprep.subr.bf16.mxu0 %v3953_v54 }
 0x10d   : > { %1981 = vmatpush1.bf16.msra.mxu1 %v3954_v16  ;;  %2173 = vmatpush1.bf16.msra.mxu0 %v3955_v36 }
 0x10e   : > { %1983 = vmatprep.subr.bf16.mxu1 %v3956_v49  ;;  %2175 = vmatprep.subr.bf16.mxu0 %v3957_v27 }
 0x111   : > { %1985 = vmatpush1.bf16.msra.mxu1 %v3958_v50  ;;  %2177 = vmatpush1.bf16.msra.mxu0 %v3959_v18 }
 0x112   : > { %1987 = vmatprep.subr.bf16.mxu1 %v1986_v1  ;;  %2179 = vmatprep.subr.bf16.mxu0 %v3960_v13  ;;  %v3967_v1 = vpack.c.bf16 %v3842_v53, %v3841_v0  ;;  %v3974_v53 = vld [vmem:[#allocation102_spill] sm:$0xff]  ;;  %v3975_v0 = vld [vmem:[#allocation100_spill] sm:$0xff] }
 0x115   : > { %1989 = vmatpush1.bf16.msra.mxu1 %v3961_v37  ;;  %2181 = vmatpush1.bf16.msra.mxu0 %v3962_v26 }
 0x116   : > { %1991 = vmatprep.subr.bf16.mxu1 %v3963_v43  ;;  %2183 = vmatprep.subr.bf16.mxu0 %v3964_v14 }
 0x119   : > { %1993 = vmatpush1.bf16.msra.mxu1 %v3965_v62  ;;  %2185 = vmatpush1.bf16.msra.mxu0 %v3966_v21 }
 0x11a   : > { %1995 = vmatprep.subr.bf16.mxu1 %v3967_v1  ;;  %2187 = vmatprep.subr.bf16.mxu0 %v3968_v22 }
 0x11d   : > { %1997 = vmatpush1.bf16.msra.mxu1 %v3969_v31  ;;  %2189 = vmatpush1.bf16.msra.mxu0 %v3970_v2 }
 0x11e   : > { %1999 = vmatprep.subr.bf16.mxu1 %v3971_v34  ;;  %2191 = vmatprep.subr.bf16.mxu0 %v3972_v11 }
 0x121   : > { %2001 = vmatpush1.bf16.msra.mxu1 %v3973_v7  ;;  %2193 = vmatpush1.bf16.msra.mxu0 %v3974_v53 }
 0x124   : > { %1061 = vmatmul.mubr.f32.vlgmr.msra.gmra.mrb[0].mxu1 %v3975_v0  ;;  %1634 = vmatmul.mubr.f32.vlgmr.msra.gmra.mrb[0].mxu0 %v3897_v29 }
 0x125   : > { %1068 = vmatprep.mubr.f32.mxu1 %v3976_v24  ;;  %1640 = vmatprep.mubr.f32.mxu0 %v3207_v4 }
 0x128   : > { %1071 = vmatmul.mubr.f32.gmra.mrb[2].mxu1 %v3977_v52  ;;  %1642 = vmatmul.mubr.f32.gmra.mrb[2].mxu0 %v3227_v55 }
 0x1f7   : > { %v1062_v48 = vpop.f32.mrb[0].mxu1  ;;  %v1635_v3 = vpop.f32.mrb[0].mxu0 }
 0x1f8   : > { %v2194_v38 = vadd.f32 %v1635_v3, %v1062_v48  ;;  %v1064_v32 = vpop.f32.mrb[1].mxu1  ;;  %v1637_v63 = vpop.f32.mrb[1].mxu0 }
 0x1f9   : > { %v2195_v20 = vadd.f32 %v1637_v63, %v1064_v32 }
 0x1fa   : > { %1663 = vst [vmem:[%s215_s19] sm:$0xff] %v2194_v38 }
 0x1fb   : > { %1664 = vst [vmem:[%s215_s19 + $0x8] sm:$0xff] %v2195_v20  ;;  %v1072_v4 = vpop.f32.mrb[2].mxu1  ;;  %v1643_v55 = vpop.f32.mrb[2].mxu0 }
 0x1fc   : > { %v2196_v29 = vadd.f32 %v1643_v55, %v1072_v4  ;;  %v1074_v58 = vpop.f32.mrb[3].mxu1  ;;  %v1645_v25 = vpop.f32.mrb[3].mxu0 }
 0x1fd   : > { %v2197_v42 = vadd.f32 %v1645_v25, %v1074_v58 }
 0x1fe   : > { %1665 = vst [vmem:[%s215_s19 + $0x10] sm:$0xff] %v2196_v29 }
 0x1ff   : > { %1666 = vst [vmem:[%s215_s19 + $0x18] sm:$0xff] %v2197_v42 }
 0x200   : > { %2364 = shalt.err (!%p2361_p6)
}
 0x201   : > { %s2365_s24 = scalar_lea.hbm %s3510_s6, 512  ;;  %s2369_s26 = scalar_lea.hbm %s3560_s2, 1536 }
 0x202   : > { %p2366_p1 = scmp.ne.s32.totalorder %s3510_s6, %s2365_s24  ;;  %p2370_p12 = scmp.lt.u32.totalorder %s3510_s6, %s3560_s2 }
 0x203   : > { %p2371_p2 = scmp.lt.u32.totalorder %s2369_s26, %s2365_s24  ;;  %p2373_p9 = scmp.lt.u32.totalorder %s2365_s24, %s3510_s6 }
 0x204   : > { %p2367_p5 = pnand %p2366_p1, %p3978_p11 }
 0x205   : > { %p2372_p8 = por %p2371_p2, %p2370_p12 }
 0x206   : > { %p2368_p7 = pneg %p2367_p5 }
 0x207   : > { %p2374_p4 = por %p2373_p9, %p2372_p8 }
 0x209   : > { %p2375_p13 = pnand %p2374_p4, %p2368_p7 }
 0x20b   : > { %2378 = shalt.err (!%p2375_p13)
}
 0x20c   : > { %s2445_s17 = smov 256   ;;  %s2446_s19 = smov 768  }
 0x20d   : > { %s2447_s8 = smov 16  }
 0x20e   : > { %2220 = dma.vmem_to_hbm [thread:$0]  (%p3978_p11), %s3505_s22, 512, %s3510_s6, %s1668_s12, %s2445_s17, %s2446_s19, %s2447_s8  }
 0x20f PF: > { %p2237_p0 = scmp.ge.s32.totalorder %s2437_s14, 2  ;;  %s1699_s15 = sand.u32 1, %s2417_s9  }
 0x210   : > { %p3979_p10 = scmp.ne.s32.totalorder %s3711_s21, 0  ;;  %s1700_s5 = scalar_lea.sflag [#allocation5], %s1699_s15 }
 0x212   : > { %p2231_p3 = pnand %p2237_p0, %p3979_p10 }
 0x214   : > { %2412 = dma.done.wait (!%p2231_p3), %s1700_s5, 512  }
 0x215   : > { %2414 = vsyncadd (!%p2231_p3), %s1700_s5, 4294966784  ;;  %s19_s14 = sadd.s32 1, %s2437_s14   ;;  %s3980_s9 = smov %s2421_s10 }
 0x216   : > { %p16_p6 = scmp.ge.s32.totalorder %s19_s14, 5   ;;  %s3981_s10 = smov %s2425_s11 }
 0x217   : > { %s3982_s11 = smov %s2576_s7  ;;  %s3983_s12 = smov %s2433_s13 }
 0x218   : > { %s3984_s13 = smov %s3986_s27  ;;  %18 = sbr.rel (!%p16_p6) target bundleno = 7 (0x7), region = 87 }
 0x21f   :  { %1705 = vsyncpa [#allocation4], 1 }
 0x220   :  { %1707 = vsyncpa [#allocation4 + $0x1], 1 }
 0x221   :  { %1708 = vsyncpa [#allocation7], 1 }
 0x222   :  { %1710 = vsyncpa [#allocation7 + $0x1], 1 }
 0x223   :  { %1711 = vsyncpa [#allocation5], 1 }
 0x224   :  { %1713 = vsyncpa [#allocation5 + $0x1], 1 }

</bundles_post_ra>
